<compile_context>
chip_gen: v7x
topology: tpu7x:2x2x1
jax: 0.10.0
libtpu: 0.0.40
codegen_flags: <defaults>
</compile_context>

<pallas_src>
import functools

import jax
import jax.numpy as jnp
from jax.experimental import pallas as pl
from jax.experimental.pallas import tpu as pltpu

EPS = 1e-3
_LANE = 128


def _round_up(x, m):
    return (x + m - 1) // m * m


def _fused_kernel(x_ref, s_ref, w_ref, g_ref, b_ref, o_ref, *, hw_true):
    # x_ref: (N, Cin, HW_p)   bf16  activation (spatial zero-padded to 128k)
    # s_ref: (N, Cin, 1)      f32   pre-sigmoid gate
    # w_ref: (Ct, Cin)        bf16  1x1-conv weight tile (rows = out channels)
    # g_ref: (Ct, 1)          f32   BN gamma tile
    # b_ref: (Ct, 1)          f32   BN beta tile
    # o_ref: (N, Ct, HW_p)    f32   output tile
    n_batch = x_ref.shape[0]
    ct = w_ref.shape[0]

    w = w_ref[...]                                           # (Ct, Cin) bf16
    gate = jax.nn.sigmoid(s_ref[...]).astype(jnp.bfloat16)   # (N, Cin, 1) EUP

    m_total = n_batch * hw_true                              # true (unpadded) count
    s1 = jnp.zeros((ct, 1), jnp.float32)
    s2 = jnp.zeros((ct, 1), jnp.float32)

    # Static (trace-time) loop over the small batch dim. z_n is staged through
    # the resident o_ref VMEM block (no Python-list accumulator -> no spills).
    for n in range(n_batch):
        y_n = x_ref[n] * gate[n]                             # (Cin, HW_p) bf16
        z_n = jnp.dot(w, y_n, preferred_element_type=jnp.float32)  # (Ct, HW_p) MXU
        o_ref[n] = z_n
        # Padded HW columns are exactly zero (W @ 0), so they contribute
        # nothing to the one-pass per-channel statistics.
        s1 = s1 + jnp.sum(z_n, axis=1, keepdims=True)        # (Ct, 1)
        s2 = s2 + jnp.sum(z_n * z_n, axis=1, keepdims=True)  # (Ct, 1)

    mean = s1 / m_total
    var = jnp.maximum(s2 / m_total - mean * mean, 0.0)       # clamp cancellation
    inv = jax.lax.rsqrt(var + EPS)                           # EUP (free slot)
    scale = inv * g_ref[...]                                 # (Ct, 1)
    shift = b_ref[...] - mean * scale                        # (Ct, 1)

    for n in range(n_batch):
        o_ref[n] = o_ref[n] * scale + shift                  # single FMA per tile


def _num_cout_tiles(cout):
    # v7x has two TensorCores per chip: split Cout into two balanced
    # "parallel" tiles so each core runs exactly one step (and computes the
    # sigmoid/gating exactly once). Single-TC chips (v5e/v6e): one grid step.
    try:
        kind = jax.devices()[0].device_kind.lower()
    except Exception:
        kind = ""
    if "v7" in kind and cout >= 64:
        return 2
    return 1


def _vmem_block_bytes(shape, dtype):
    # Real VMEM footprint of one block: last dim pads to 128 lanes,
    # second-to-last pads to the dtype's sublane packing.
    itemsize = jnp.dtype(dtype).itemsize
    sub = {4: 8, 2: 16, 1: 32}.get(itemsize, 8)
    lead = 1
    for d in shape[:-2]:
        lead *= int(d)
    rows = int(shape[-2]) if len(shape) >= 2 else 1
    cols = int(shape[-1])
    return lead * _round_up(rows, sub) * _round_up(cols, _LANE) * itemsize


def fused_sigmoid_mul_conv_bn(x853, x857, weight, gamma, beta):
    """x853: (N, Cin, H, W), x857: (N, Cin, 1, 1), weight: (Cout, Cin, 1, 1)."""
    N, Cin, H, W = x853.shape
    Cout = weight.shape[0]
    HW = H * W

    # Lane-dense RHS / output stores: zero-pad HW to a multiple of 128.
    HW_p = _round_up(HW, _LANE)

    n_tiles = _num_cout_tiles(Cout)
    if n_tiles > 1:
        Cout_p = _round_up(Cout, 32)   # each tile % 16 == 0 (bf16 sublane pack)
    else:
        Cout_p = Cout                  # full-extent blocks: no padding needed
    tile_co = Cout_p // n_tiles

    # NCHW stays put: pure reshape views plus a zero-pad of the spatial axis.
    x_r = x853.reshape(N, Cin, HW).astype(jnp.bfloat16)
    if HW_p != HW:
        x_r = jnp.pad(x_r, ((0, 0), (0, 0), (0, HW_p - HW)))
    s_r = x857.reshape(N, Cin, 1).astype(jnp.float32)

    w2 = weight.reshape(Cout, Cin).astype(jnp.bfloat16)      # pre-cast once
    g1 = gamma.astype(jnp.float32)
    b1 = beta.astype(jnp.float32)
    if Cout_p != Cout:
        w2 = jnp.pad(w2, ((0, Cout_p - Cout), (0, 0)))
        g1 = jnp.pad(g1, (0, Cout_p - Cout))
        b1 = jnp.pad(b1, (0, Cout_p - Cout))
    g2 = g1.reshape(Cout_p, 1)
    b2 = b1.reshape(Cout_p, 1)

    # ---- VMEM budget (lane/sublane padded, double-buffered) -----------------
    block_shapes = [
        ((N, Cin, HW_p), jnp.bfloat16),      # x (full)
        ((N, Cin, 1), jnp.float32),          # gate (lane dim pads to 128)
        ((tile_co, Cin), jnp.bfloat16),      # weight tile
        ((tile_co, 1), jnp.float32),         # gamma tile
        ((tile_co, 1), jnp.float32),         # beta tile
        ((N, tile_co, HW_p), jnp.float32),   # output tile
    ]
    step_bytes = 2 * sum(_vmem_block_bytes(s, d) for s, d in block_shapes)

    try:
        info = pltpu.get_tpu_info()
        vmem_cap = int(getattr(info, "vmem_capacity_bytes", 64 << 20))
    except Exception:
        vmem_cap = 64 << 20                  # v7x per-TC physical (smallest gen)
    # TODO(synk): if N*Cin*HW ever pushes step_bytes near vmem_cap, add an HW
    # grid axis with two-pass BN (accumulate per-channel sum/sumsq in VMEM
    # scratch over an "arbitrary" axis, finalize with pl.when).
    assert step_bytes < vmem_cap - (8 << 20), (
        f"single-block plan needs {step_bytes} B VMEM; capacity {vmem_cap} B")
    # Scoped-VMEM defaults: 16 MiB (v5e) / 32 MiB (v6e, v7x). Only raise the
    # limit when the padded footprint actually needs it.
    vmem_limit = None
    if step_bytes > (12 << 20):
        vmem_limit = int(min(step_bytes + (4 << 20), vmem_cap - (4 << 20)))

    # ---- Cost estimate so XLA schedules neighbors around this tiny call -----
    matmul_flops = 2 * N * Cout_p * Cin * HW_p
    elemwise_flops = 2 * N * Cin * HW_p + 4 * N * Cout_p * HW_p
    hbm_bytes = (x_r.size * 2 + s_r.size * 4 + w2.size * 2
                 + (g2.size + b2.size) * 4 + N * Cout_p * HW_p * 4)
    cost = pl.CostEstimate(
        flops=matmul_flops + elemwise_flops,
        transcendentals=N * Cin + Cout_p,
        bytes_accessed=hbm_bytes,
    )

    kernel = functools.partial(_fused_kernel, hw_true=HW)

    out = pl.pallas_call(
        kernel,
        out_shape=jax.ShapeDtypeStruct((N, Cout_p, HW_p), jnp.float32),
        grid_spec=pltpu.PrefetchScalarGridSpec(
            num_scalar_prefetch=0,
            grid=(n_tiles,),
            in_specs=[
                pl.BlockSpec((N, Cin, HW_p), lambda j: (0, 0, 0)),    # x (full)
                pl.BlockSpec((N, Cin, 1), lambda j: (0, 0, 0)),       # gate (full)
                pl.BlockSpec((tile_co, Cin), lambda j: (j, 0)),       # weight tile
                pl.BlockSpec((tile_co, 1), lambda j: (j, 0)),         # gamma tile
                pl.BlockSpec((tile_co, 1), lambda j: (j, 0)),         # beta tile
            ],
            out_specs=pl.BlockSpec((N, tile_co, HW_p), lambda j: (0, j, 0)),
        ),
        compiler_params=pltpu.CompilerParams(
            dimension_semantics=("parallel",),
            vmem_limit_bytes=vmem_limit,
        ),
        cost_estimate=cost,
    )(x_r, s_r, w2, g2, b2)

    # Drop padded channels/spatial columns; reshape back to NCHW (view).
    return out[:, :Cout, :HW].reshape(N, Cout, H, W)


def _reference(x853, x857, weight, gamma, beta):
    """Pure-JAX reference mirroring the PyTorch module (training-mode BN)."""
    Cout = weight.shape[0]
    y = jax.nn.sigmoid(x857) * x853                      # (N, Cin, H, W)
    z = jax.lax.conv_general_dilated(
        y, weight, window_strides=(1, 1), padding="VALID",
        dimension_numbers=("NCHW", "OIHW", "NCHW"),
        precision=jax.lax.Precision.HIGHEST)             # (N, Cout, H, W)
    mean = jnp.mean(z, axis=(0, 2, 3), keepdims=True)
    var = jnp.mean((z - mean) ** 2, axis=(0, 2, 3), keepdims=True)
    out = (z - mean) / jnp.sqrt(var + EPS)
    return out * gamma.reshape(1, Cout, 1, 1) + beta.reshape(1, Cout, 1, 1)


if __name__ == "__main__":
    # Small shapes consistent with the module (original: N=1, Cin=2304,
    # Cout=384, 7x7). N=2 exercises the batch loop + global BN stats; Cout=192
    # exercises the Cout tiling path on multi-TC chips; H=W=7 exercises the
    # HW 49 -> 128 lane-padding path.
    N, Cin, Cout, H, W = 2, 256, 192, 7, 7

    key = jax.random.PRNGKey(0)
    k1, k2, k3, k4, k5 = jax.random.split(key, 5)
    x853 = jax.random.normal(k1, (N, Cin, H, W), jnp.float32)
    x857 = jax.random.normal(k2, (N, Cin, 1, 1), jnp.float32)
    weight = jax.random.normal(k3, (Cout, Cin, 1, 1), jnp.float32) * 0.02
    gamma = jax.random.normal(k4, (Cout,), jnp.float32) * 0.1 + 1.0
    beta = jax.random.normal(k5, (Cout,), jnp.float32) * 0.1

    out = fused_sigmoid_mul_conv_bn(x853, x857, weight, gamma, beta)
    out = jax.block_until_ready(out)

    ref = _reference(x853, x857, weight, gamma, beta)
    assert out.shape == (N, Cout, H, W)
    # Tolerance accounts for bf16 x / gate / weight into the MXU (f32
    # accumulation) vs the all-f32 HIGHEST-precision reference; observed
    # error is well inside this bound.
    assert jnp.allclose(out, ref, atol=3e-2, rtol=3e-2), "mismatch vs reference"

    print("KERNEL_OK")
</pallas_src>

<mosaic_0001>
module attributes {stable_mosaic.version = 11 : i64} {
  func.func @_fused_kernel(%arg0: i32, %arg1: memref<2x256x128xbf16, #tpu.memory_space<vmem>>, %arg2: memref<2x256x1xf32, #tpu.memory_space<vmem>>, %arg3: memref<192x256xbf16, #tpu.memory_space<vmem>>, %arg4: memref<192x1xf32, #tpu.memory_space<vmem>>, %arg5: memref<192x1xf32, #tpu.memory_space<vmem>>, %arg6: memref<2x192x128xf32, #tpu.memory_space<vmem>>) attributes {dimension_semantics = [#tpu.dimension_semantics<parallel>], iteration_bounds = array<i64: 1>, scalar_prefetch = 0 : i64, scratch_operands = 0 : i64, tpu.core_type = #tpu.core_type<tc>, window_params = [{pipeline_mode = #tpu.pipeline_mode<synchronous>, transform_indices = @transform_0, window_bounds = array<i64: 2, 256, 128>}, {pipeline_mode = #tpu.pipeline_mode<synchronous>, transform_indices = @transform_1, window_bounds = array<i64: 2, 256, 1>}, {transform_indices = @transform_2, window_bounds = array<i64: 192, 256>}, {transform_indices = @transform_3, window_bounds = array<i64: 192, 1>}, {transform_indices = @transform_4, window_bounds = array<i64: 192, 1>}, {transform_indices = @transform_5, window_bounds = array<i64: 2, 192, 128>}]} {
    %c0 = arith.constant 0 : index
    %c0_0 = arith.constant 0 : index
    %0 = vector.load %arg3[%c0, %c0_0] : memref<192x256xbf16, #tpu.memory_space<vmem>>, vector<192x256xbf16>
    %c0_1 = arith.constant 0 : index
    %c0_2 = arith.constant 0 : index
    %c0_3 = arith.constant 0 : index
    %1 = vector.load %arg2[%c0_1, %c0_2, %c0_3] : memref<2x256x1xf32, #tpu.memory_space<vmem>>, vector<2x256x1xf32>
    %2 = arith.negf %1 : vector<2x256x1xf32>
    %3 = math.exp %2 : vector<2x256x1xf32>
    %cst = arith.constant 1.000000e+00 : f32
    %4 = vector.broadcast %cst : f32 to vector<2x256x1xf32>
    %5 = arith.addf %4, %3 : vector<2x256x1xf32>
    %6 = arith.divf %4, %5 : vector<2x256x1xf32>
    %7 = arith.truncf %6 : vector<2x256x1xf32> to vector<2x256x1xbf16>
    %cst_4 = arith.constant 0.000000e+00 : f32
    %8 = vector.broadcast %cst_4 : f32 to vector<192x1xf32>
    %cst_5 = arith.constant 0.000000e+00 : f32
    %9 = vector.broadcast %cst_5 : f32 to vector<192x1xf32>
    %c0_6 = arith.constant 0 : index
    %c0_7 = arith.constant 0 : index
    %c0_8 = arith.constant 0 : index
    %10 = vector.load %arg1[%c0_6, %c0_7, %c0_8] : memref<2x256x128xbf16, #tpu.memory_space<vmem>>, vector<1x256x128xbf16>
    %11 = vector.shape_cast %10 : vector<1x256x128xbf16> to vector<256x128xbf16>
    %12 = vector.extract_strided_slice %7 {offsets = [0, 0, 0], sizes = [1, 256, 1], strides = [1, 1, 1]} : vector<2x256x1xbf16> to vector<1x256x1xbf16>
    %13 = vector.shape_cast %12 : vector<1x256x1xbf16> to vector<256x1xbf16>
    %14 = vector.broadcast %13 : vector<256x1xbf16> to vector<256x128xbf16>
    %15 = arith.mulf %11, %14 : vector<256x128xbf16>
    %cst_9 = arith.constant dense<0.000000e+00> : vector<192x128xf32>
    %16 = tpu.matmul %0, %15, %cst_9 {dimension_numbers = #tpu.dot_dimension_numbers<[1], [0], [0], [1], [0, 0, 1, 1], [], []>} : vector<192x256xbf16>, vector<256x128xbf16>, vector<192x128xf32> -> vector<192x128xf32>
    %c0_10 = arith.constant 0 : index
    %c0_11 = arith.constant 0 : index
    %c0_12 = arith.constant 0 : index
    %17 = vector.load %arg6[%c0_10, %c0_11, %c0_12] : memref<2x192x128xf32, #tpu.memory_space<vmem>>, vector<1x192x128xf32>
    %18 = vector.shape_cast %17 : vector<1x192x128xf32> to vector<192x128xf32>
    %19 = vector.shape_cast %16 : vector<192x128xf32> to vector<1x192x128xf32>
    tpu.vector_store %arg6[%c0_10, %c0_11, %c0_12], %19 {strides = array<i32>} : memref<2x192x128xf32, #tpu.memory_space<vmem>>, vector<1x192x128xf32>,
    %cst_13 = arith.constant dense<0.000000e+00> : vector<192xf32>
    %20 = vector.multi_reduction <add>, %16, %cst_13 [1] : vector<192x128xf32> to vector<192xf32>
    %21 = vector.shape_cast %20 : vector<192xf32> to vector<192x1xf32>
    %22 = arith.addf %8, %21 : vector<192x1xf32>
    %23 = arith.mulf %16, %16 : vector<192x128xf32>
    %cst_14 = arith.constant dense<0.000000e+00> : vector<192xf32>
    %24 = vector.multi_reduction <add>, %23, %cst_14 [1] : vector<192x128xf32> to vector<192xf32>
    %25 = vector.shape_cast %24 : vector<192xf32> to vector<192x1xf32>
    %26 = arith.addf %9, %25 : vector<192x1xf32>
    %c1 = arith.constant 1 : index
    %c0_15 = arith.constant 0 : index
    %c0_16 = arith.constant 0 : index
    %27 = vector.load %arg1[%c1, %c0_15, %c0_16] : memref<2x256x128xbf16, #tpu.memory_space<vmem>>, vector<1x256x128xbf16>
    %28 = vector.shape_cast %27 : vector<1x256x128xbf16> to vector<256x128xbf16>
    %29 = vector.extract_strided_slice %7 {offsets = [1, 0, 0], sizes = [1, 256, 1], strides = [1, 1, 1]} : vector<2x256x1xbf16> to vector<1x256x1xbf16>
    %30 = vector.shape_cast %29 : vector<1x256x1xbf16> to vector<256x1xbf16>
    %31 = vector.broadcast %30 : vector<256x1xbf16> to vector<256x128xbf16>
    %32 = arith.mulf %28, %31 : vector<256x128xbf16>
    %cst_17 = arith.constant dense<0.000000e+00> : vector<192x128xf32>
    %33 = tpu.matmul %0, %32, %cst_17 {dimension_numbers = #tpu.dot_dimension_numbers<[1], [0], [0], [1], [0, 0, 1, 1], [], []>} : vector<192x256xbf16>, vector<256x128xbf16>, vector<192x128xf32> -> vector<192x128xf32>
    %c1_18 = arith.constant 1 : index
    %c0_19 = arith.constant 0 : index
    %c0_20 = arith.constant 0 : index
    %34 = vector.load %arg6[%c1_18, %c0_19, %c0_20] : memref<2x192x128xf32, #tpu.memory_space<vmem>>, vector<1x192x128xf32>
    %35 = vector.shape_cast %34 : vector<1x192x128xf32> to vector<192x128xf32>
    %36 = vector.shape_cast %33 : vector<192x128xf32> to vector<1x192x128xf32>
    tpu.vector_store %arg6[%c1_18, %c0_19, %c0_20], %36 {strides = array<i32>} : memref<2x192x128xf32, #tpu.memory_space<vmem>>, vector<1x192x128xf32>,
    %cst_21 = arith.constant dense<0.000000e+00> : vector<192xf32>
    %37 = vector.multi_reduction <add>, %33, %cst_21 [1] : vector<192x128xf32> to vector<192xf32>
    %38 = vector.shape_cast %37 : vector<192xf32> to vector<192x1xf32>
    %39 = arith.addf %22, %38 : vector<192x1xf32>
    %40 = arith.mulf %33, %33 : vector<192x128xf32>
    %cst_22 = arith.constant dense<0.000000e+00> : vector<192xf32>
    %41 = vector.multi_reduction <add>, %40, %cst_22 [1] : vector<192x128xf32> to vector<192xf32>
    %42 = vector.shape_cast %41 : vector<192xf32> to vector<192x1xf32>
    %43 = arith.addf %26, %42 : vector<192x1xf32>
    %cst_23 = arith.constant 9.800000e+01 : f32
    %44 = vector.broadcast %cst_23 : f32 to vector<192x1xf32>
    %45 = arith.divf %39, %44 : vector<192x1xf32>
    %cst_24 = arith.constant 9.800000e+01 : f32
    %46 = vector.broadcast %cst_24 : f32 to vector<192x1xf32>
    %47 = arith.divf %43, %46 : vector<192x1xf32>
    %48 = arith.mulf %45, %45 : vector<192x1xf32>
    %49 = arith.subf %47, %48 : vector<192x1xf32>
    %cst_25 = arith.constant 0.000000e+00 : f32
    %50 = vector.broadcast %cst_25 : f32 to vector<192x1xf32>
    %51 = arith.maximumf %49, %50 : vector<192x1xf32>
    %cst_26 = arith.constant 1.000000e-03 : f32
    %52 = vector.broadcast %cst_26 : f32 to vector<192x1xf32>
    %53 = arith.addf %51, %52 : vector<192x1xf32>
    %54 = math.rsqrt %53 : vector<192x1xf32>
    %c0_27 = arith.constant 0 : index
    %c0_28 = arith.constant 0 : index
    %55 = vector.load %arg4[%c0_27, %c0_28] : memref<192x1xf32, #tpu.memory_space<vmem>>, vector<192x1xf32>
    %56 = arith.mulf %54, %55 : vector<192x1xf32>
    %c0_29 = arith.constant 0 : index
    %c0_30 = arith.constant 0 : index
    %57 = vector.load %arg5[%c0_29, %c0_30] : memref<192x1xf32, #tpu.memory_space<vmem>>, vector<192x1xf32>
    %58 = arith.mulf %45, %56 : vector<192x1xf32>
    %59 = arith.subf %57, %58 : vector<192x1xf32>
    %c0_31 = arith.constant 0 : index
    %c0_32 = arith.constant 0 : index
    %c0_33 = arith.constant 0 : index
    %60 = vector.load %arg6[%c0_31, %c0_32, %c0_33] : memref<2x192x128xf32, #tpu.memory_space<vmem>>, vector<1x192x128xf32>
    %61 = vector.shape_cast %60 : vector<1x192x128xf32> to vector<192x128xf32>
    %62 = vector.broadcast %56 : vector<192x1xf32> to vector<192x128xf32>
    %63 = arith.mulf %61, %62 : vector<192x128xf32>
    %64 = vector.broadcast %59 : vector<192x1xf32> to vector<192x128xf32>
    %65 = arith.addf %63, %64 : vector<192x128xf32>
    %c0_34 = arith.constant 0 : index
    %c0_35 = arith.constant 0 : index
    %c0_36 = arith.constant 0 : index
    %66 = vector.load %arg6[%c0_34, %c0_35, %c0_36] : memref<2x192x128xf32, #tpu.memory_space<vmem>>, vector<1x192x128xf32>
    %67 = vector.shape_cast %66 : vector<1x192x128xf32> to vector<192x128xf32>
    %68 = vector.shape_cast %65 : vector<192x128xf32> to vector<1x192x128xf32>
    tpu.vector_store %arg6[%c0_34, %c0_35, %c0_36], %68 {strides = array<i32>} : memref<2x192x128xf32, #tpu.memory_space<vmem>>, vector<1x192x128xf32>,
    %c1_37 = arith.constant 1 : index
    %c0_38 = arith.constant 0 : index
    %c0_39 = arith.constant 0 : index
    %69 = vector.load %arg6[%c1_37, %c0_38, %c0_39] : memref<2x192x128xf32, #tpu.memory_space<vmem>>, vector<1x192x128xf32>
    %70 = vector.shape_cast %69 : vector<1x192x128xf32> to vector<192x128xf32>
    %71 = vector.broadcast %56 : vector<192x1xf32> to vector<192x128xf32>
    %72 = arith.mulf %70, %71 : vector<192x128xf32>
    %73 = vector.broadcast %59 : vector<192x1xf32> to vector<192x128xf32>
    %74 = arith.addf %72, %73 : vector<192x128xf32>
    %c1_40 = arith.constant 1 : index
    %c0_41 = arith.constant 0 : index
    %c0_42 = arith.constant 0 : index
    %75 = vector.load %arg6[%c1_40, %c0_41, %c0_42] : memref<2x192x128xf32, #tpu.memory_space<vmem>>, vector<1x192x128xf32>
    %76 = vector.shape_cast %75 : vector<1x192x128xf32> to vector<192x128xf32>
    %77 = vector.shape_cast %74 : vector<192x128xf32> to vector<1x192x128xf32>
    tpu.vector_store %arg6[%c1_40, %c0_41, %c0_42], %77 {strides = array<i32>} : memref<2x192x128xf32, #tpu.memory_space<vmem>>, vector<1x192x128xf32>,
    return
  }
  func.func @transform_0(%arg0: i32) -> (i32, i32, i32) {
    %c0_i32 = arith.constant 0 : i32
    %c0_i32_0 = arith.constant 0 : i32
    %c0_i32_1 = arith.constant 0 : i32
    %c0_i32_2 = arith.constant 0 : i32
    return %c0_i32, %c0_i32_0, %c0_i32_1 : i32, i32, i32
  }
  func.func @transform_1(%arg0: i32) -> (i32, i32, i32) {
    %c0_i32 = arith.constant 0 : i32
    %c0_i32_0 = arith.constant 0 : i32
    %c0_i32_1 = arith.constant 0 : i32
    %c0_i32_2 = arith.constant 0 : i32
    return %c0_i32, %c0_i32_0, %c0_i32_1 : i32, i32, i32
  }
  func.func @transform_2(%arg0: i32) -> (i32, i32) {
    %c0_i32 = arith.constant 0 : i32
    %c0_i32_0 = arith.constant 0 : i32
    return %arg0, %c0_i32 : i32, i32
  }
  func.func @transform_3(%arg0: i32) -> (i32, i32) {
    %c0_i32 = arith.constant 0 : i32
    %c0_i32_0 = arith.constant 0 : i32
    return %arg0, %c0_i32 : i32, i32
  }
  func.func @transform_4(%arg0: i32) -> (i32, i32) {
    %c0_i32 = arith.constant 0 : i32
    %c0_i32_0 = arith.constant 0 : i32
    return %arg0, %c0_i32 : i32, i32
  }
  func.func @transform_5(%arg0: i32) -> (i32, i32, i32) {
    %c0_i32 = arith.constant 0 : i32
    %c0_i32_0 = arith.constant 0 : i32
    %c0_i32_1 = arith.constant 0 : i32
    return %c0_i32, %arg0, %c0_i32_0 : i32, i32, i32
  }
}

</mosaic_0001>

<bundles_post_ra>
// kernel: tpu_custom_call.1
= control target key start
LH: loop header
LB: loop body
LE: loop exit
PB: predicated region body
PF: predicated region fallthrough
CT: control target
= control target key end

     0   :  { %v3719_v3 = vmov 0   ;;  %s4783_s0 = inlined_call_operand.vmem [shape: bf16[2,256,128], index: 0, kind: input, shape index: {}]   ;;  %s4784_s1 = inlined_call_operand.vmem [shape: f32[2,256,1], index: 1, kind: input, shape index: {}]   ;;  %s4785_s2 = inlined_call_operand.vmem [shape: bf16[192,256], index: 2, kind: input, shape index: {}]   ;;  %s4786_s3 = inlined_call_operand.vmem [shape: f32[192,1], index: 3, kind: input, shape index: {}]   ;;  %s4787_s4 = inlined_call_operand.vmem [shape: f32[192,1], index: 4, kind: input, shape index: {}]   ;;  %s4788_s5 = inlined_call_operand.hbm [shape: f32[2,192,128], index: 5, kind: output, shape index: {}]  }
   0x1   :  { %v62_v0 = vld [vmem:[%s4784_s1 + $0x80] sm:$0xff]  ;;  %v63_v1 = vld [vmem:[%s4784_s1 + $0x88] sm:$0xff]  ;;  %3354 = vset.pattern.permute.xlu1 %v3719_v3  ;;  %3353 = vset.pattern.permute.xlu0 %v3719_v3  ;;  %v64_v15 = vld [vmem:[%s4784_s1 + $0x90] sm:$0xff] }
   0x2   :  { %v46_v2 = vld [vmem:[%s4784_s1] sm:$0xff]  ;;  %v3035_v4 = vmul.f32 -1.442695, %v62_v0  ;;  %v3036_v5 = vmul.f32 -1.442695, %v63_v1  ;;  %v47_v6 = vld [vmem:[%s4784_s1 + $0x8] sm:$0xff] }
   0x3   :  { %v94_v7 = vld [vmem:[%s4784_s1 + $0x180] sm:$0xff]  ;;  %v3019_v8 = vmul.f32 -1.442695, %v46_v2  ;;  %v3020_v9 = vmul.f32 -1.442695, %v47_v6  ;;  %v95_v10 = vld [vmem:[%s4784_s1 + $0x188] sm:$0xff] }
   0x4   :  { %v78_v11 = vld [vmem:[%s4784_s1 + $0x100] sm:$0xff]  ;;  %3391 = vpow2.f32 %v3035_v4  ;;  %v3067_v12 = vmul.f32 -1.442695, %v94_v7  ;;  %v79_v13 = vld [vmem:[%s4784_s1 + $0x108] sm:$0xff]  ;;  %v3068_v14 = vmul.f32 -1.442695, %v95_v10 }
   0x5   :  { %3393 = vpow2.f32 %v3036_v5  ;;  %v3051_v16 = vmul.f32 -1.442695, %v78_v11  ;;  %v65_v17 = vld [vmem:[%s4784_s1 + $0x98] sm:$0xff]  ;;  %v3052_v18 = vmul.f32 -1.442695, %v79_v13  ;;  %v96_v19 = vld [vmem:[%s4784_s1 + $0x190] sm:$0xff] }
   0x6   :  { %3395 = vpow2.f32 %v3019_v8  ;;  %v3037_v20 = vmul.f32 -1.442695, %v64_v15  ;;  %v97_v21 = vld [vmem:[%s4784_s1 + $0x198] sm:$0xff]  ;;  %v3038_v22 = vmul.f32 -1.442695, %v65_v17  ;;  %v48_v23 = vld [vmem:[%s4784_s1 + $0x10] sm:$0xff] }
   0x7   :  { %3397 = vpow2.f32 %v3020_v9  ;;  %v3069_v24 = vmul.f32 -1.442695, %v96_v19  ;;  %v3070_v25 = vmul.f32 -1.442695, %v97_v21  ;;  %v3021_v26 = vmul.f32 -1.442695, %v48_v23 }
   0x8   :  { %3399 = vpow2.f32 %v3067_v12  ;;  %v49_v44 = vld [vmem:[%s4784_s1 + $0x18] sm:$0xff]  ;;  %v80_v49 = vld [vmem:[%s4784_s1 + $0x110] sm:$0xff]  ;;  %v66_v56 = vld [vmem:[%s4784_s1 + $0xa0] sm:$0xff] }
   0x9   :  { %3401 = vpow2.f32 %v3068_v14  ;;  %v3022_v52 = vmul.f32 -1.442695, %v49_v44  ;;  %v81_v53 = vld [vmem:[%s4784_s1 + $0x118] sm:$0xff]  ;;  %v3053_v59 = vmul.f32 -1.442695, %v80_v49  ;;  %v67_v60 = vld [vmem:[%s4784_s1 + $0xa8] sm:$0xff] }
   0xa   :  { %3403 = vpow2.f32 %v3051_v16  ;;  %v3054_v62 = vmul.f32 -1.442695, %v81_v53  ;;  %v98_v63 = vld [vmem:[%s4784_s1 + $0x1a0] sm:$0xff]  ;;  %v3039_v2 = vmul.f32 -1.442695, %v66_v56  ;;  %v99_v3 = vld [vmem:[%s4784_s1 + $0x1a8] sm:$0xff] }
   0xb   :  { %3405 = vpow2.f32 %v3052_v18  ;;  %v3040_v5 = vmul.f32 -1.442695, %v67_v60  ;;  %v50_v6 = vld [vmem:[%s4784_s1 + $0x20] sm:$0xff]  ;;  %v3071_v9 = vmul.f32 -1.442695, %v98_v63  ;;  %v51_v10 = vld [vmem:[%s4784_s1 + $0x28] sm:$0xff] }
   0xc   :  { %3407 = vpow2.f32 %v3037_v20  ;;  %v3072_v12 = vmul.f32 -1.442695, %v99_v3  ;;  %v82_v13 = vld [vmem:[%s4784_s1 + $0x120] sm:$0xff]  ;;  %v3023_v16 = vmul.f32 -1.442695, %v50_v6  ;;  %v83_v17 = vld [vmem:[%s4784_s1 + $0x128] sm:$0xff] }
   0xd   :  { %3409 = vpow2.f32 %v3038_v22  ;;  %v3024_v19 = vmul.f32 -1.442695, %v51_v10  ;;  %v68_v20 = vld [vmem:[%s4784_s1 + $0xb0] sm:$0xff]  ;;  %v3055_v23 = vmul.f32 -1.442695, %v82_v13 }
   0xe   :  { %v3392_v27 = vpop.eup %3391  ;;  %3411 = vpow2.f32 %v3069_v24 }
   0xf   :  { %v3394_v28 = vpop.eup %3393  ;;  %v318_v29 = vadd.f32 1.0, %v3392_v27  ;;  %3413 = vpow2.f32 %v3070_v25  ;;  %v3056_v25 = vmul.f32 -1.442695, %v83_v17 }
  0x10   :  { %v3396_v30 = vpop.eup %3395  ;;  %v319_v31 = vadd.f32 1.0, %v3394_v28  ;;  %3415 = vpow2.f32 %v3021_v26  ;;  %v69_v26 = vld [vmem:[%s4784_s1 + $0xb8] sm:$0xff] }
  0x11   :  { %v3398_v32 = vpop.eup %3397  ;;  %3417 = vrcp.f32 %v318_v29  ;;  %v302_v33 = vadd.f32 1.0, %v3396_v30  ;;  %v3041_v29 = vmul.f32 -1.442695, %v68_v20 }
  0x12   :  { %v3400_v34 = vpop.eup %3399  ;;  %3419 = vrcp.f32 %v319_v31  ;;  %v303_v35 = vadd.f32 1.0, %v3398_v32 }
  0x13   :  { %v3402_v36 = vpop.eup %3401  ;;  %3421 = vrcp.f32 %v302_v33  ;;  %v350_v37 = vadd.f32 1.0, %v3400_v34  ;;  %v3042_v33 = vmul.f32 -1.442695, %v69_v26 }
  0x14   :  { %v3404_v38 = vpop.eup %3403  ;;  %3423 = vrcp.f32 %v303_v35  ;;  %v351_v39 = vadd.f32 1.0, %v3402_v36 }
  0x15   :  { %v3406_v40 = vpop.eup %3405  ;;  %3425 = vrcp.f32 %v350_v37  ;;  %v334_v41 = vadd.f32 1.0, %v3404_v38 }
  0x16   :  { %v3408_v42 = vpop.eup %3407  ;;  %3427 = vrcp.f32 %v351_v39  ;;  %v335_v43 = vadd.f32 1.0, %v3406_v40 }
  0x17   :  { %v3410_v45 = vpop.eup %3409  ;;  %3429 = vrcp.f32 %v334_v41  ;;  %v320_v46 = vadd.f32 1.0, %v3408_v42 }
  0x18   :  { %v3412_v47 = vpop.eup %3411  ;;  %3431 = vrcp.f32 %v335_v43  ;;  %v321_v48 = vadd.f32 1.0, %v3410_v45 }
  0x19   :  { %v3414_v50 = vpop.eup %3413  ;;  %3433 = vrcp.f32 %v320_v46  ;;  %v352_v51 = vadd.f32 1.0, %v3412_v47 }
  0x1a   :  { %v3416_v54 = vpop.eup %3415  ;;  %3435 = vrcp.f32 %v321_v48  ;;  %v353_v55 = vadd.f32 1.0, %v3414_v50 }
  0x1b   :  { %v3418_v57 = vpop.eup %3417  ;;  %3437 = vrcp.f32 %v352_v51  ;;  %v304_v58 = vadd.f32 1.0, %v3416_v54  ;;  %v100_v51 = vld [vmem:[%s4784_s1 + $0x1b0] sm:$0xff] }
  0x1c   :  { %v3420_v61 = vpop.eup %3419  ;;  %3439 = vrcp.f32 %v353_v55 }
  0x1d   :  { %v3422_v0 = vpop.eup %3421  ;;  %v502_v1 = vpack.c.bf16 %v3420_v61, %v3418_v57  ;;  %3441 = vpow2.f32 %v3022_v52 }
  0x1e   :  { %v3424_v4 = vpop.eup %3423  ;;  %3443 = vrcp.f32 %v304_v58 }
  0x1f   :  { %v3426_v7 = vpop.eup %3425  ;;  %592 = vperm.xlu0 %3353, %v502_v1   ;;  %v494_v8 = vpack.c.bf16 %v3424_v4, %v3422_v0  ;;  %3445 = vpow2.f32 %v3053_v59 }
  0x20   :  { %v3428_v11 = vpop.eup %3427  ;;  %3447 = vpow2.f32 %v3054_v62 }
  0x21   :  { %v3430_v14 = vpop.eup %3429  ;;  %560 = vperm.xlu1 %3354, %v494_v8   ;;  %v518_v15 = vpack.c.bf16 %v3428_v11, %v3426_v7  ;;  %3449 = vpow2.f32 %v3039_v2 }
  0x22   :  { %v3432_v18 = vpop.eup %3431  ;;  %3451 = vpow2.f32 %v3040_v5 }
  0x23   :  { %v3434_v21 = vpop.eup %3433  ;;  %1530 = vperm.xlu0 %3353, %v518_v15   ;;  %v510_v22 = vpack.c.bf16 %v3432_v18, %v3430_v14  ;;  %3453 = vpow2.f32 %v3071_v9 }
  0x24   :  { %v3436_v24 = vpop.eup %3435  ;;  %3455 = vpow2.f32 %v3072_v12 }
  0x25   :  { %v3438_v27 = vpop.eup %3437  ;;  %1498 = vperm.xlu1 %3354, %v510_v22   ;;  %v503_v28 = vpack.c.bf16 %v3436_v24, %v3434_v21  ;;  %3457 = vpow2.f32 %v3023_v16 }
  0x26   :  { %v3440_v30 = vpop.eup %3439  ;;  %3459 = vpow2.f32 %v3024_v19 }
  0x27   :  { %v3442_v31 = vpop.eup %3441  ;;  %596 = vperm.xlu0 %3353, %v503_v28   ;;  %v519_v32 = vpack.c.bf16 %v3440_v30, %v3438_v27  ;;  %3461 = vpow2.f32 %v3055_v23 }
  0x28   :  { %v3444_v34 = vpop.eup %3443  ;;  %v305_v35 = vadd.f32 1.0, %v3442_v31  ;;  %3463 = vpow2.f32 %v3056_v25 }
  0x29   :  { %v3446_v36 = vpop.eup %3445  ;;  %1534 = vperm.xlu1 %3354, %v519_v32   ;;  %3465 = vpow2.f32 %v3041_v29 }
  0x2a   :  { %v3448_v37 = vpop.eup %3447  ;;  %3467 = vrcp.f32 %v305_v35  ;;  %v336_v38 = vadd.f32 1.0, %v3446_v36 }
  0x2b   :  { %v3450_v39 = vpop.eup %3449  ;;  %v337_v40 = vadd.f32 1.0, %v3448_v37  ;;  %3469 = vpow2.f32 %v3042_v33 }
  0x2c   :  { %v3452_v41 = vpop.eup %3451  ;;  %3471 = vrcp.f32 %v336_v38  ;;  %v322_v42 = vadd.f32 1.0, %v3450_v39 }
  0x2d   :  { %v3454_v43 = vpop.eup %3453  ;;  %3473 = vrcp.f32 %v337_v40  ;;  %v323_v44 = vadd.f32 1.0, %v3452_v41 }
  0x2e   :  { %v3456_v45 = vpop.eup %3455  ;;  %3475 = vrcp.f32 %v322_v42  ;;  %v354_v46 = vadd.f32 1.0, %v3454_v43 }
  0x2f   :  { %v3458_v47 = vpop.eup %3457  ;;  %3477 = vrcp.f32 %v323_v44  ;;  %v355_v48 = vadd.f32 1.0, %v3456_v45 }
  0x30   :  { %v3460_v49 = vpop.eup %3459  ;;  %3479 = vrcp.f32 %v354_v46  ;;  %v306_v50 = vadd.f32 1.0, %v3458_v47 }
  0x31   :  { %10 = vsyncpa [#allocation3], 0  ;;  %v3462_v52 = vpop.eup %3461  ;;  %3481 = vrcp.f32 %v355_v48  ;;  %v307_v53 = vadd.f32 1.0, %v3460_v49  ;;  %v101_v56 = vld [vmem:[%s4784_s1 + $0x1b8] sm:$0xff]  ;;  %v3073_v59 = vmul.f32 -1.442695, %v100_v51 }
  0x32   :  { %v3464_v54 = vpop.eup %3463  ;;  %3483 = vrcp.f32 %v306_v50  ;;  %v338_v55 = vadd.f32 1.0, %v3462_v52  ;;  %v52_v60 = vld [vmem:[%s4784_s1 + $0x30] sm:$0xff]  ;;  %v53_v63 = vld [vmem:[%s4784_s1 + $0x38] sm:$0xff]  ;;  %v3074_v2 = vmul.f32 -1.442695, %v101_v56  ;;  %v70_v10 = vld [vmem:[%s4784_s1 + $0xc0] sm:$0xff] }
  0x33   :  { %v3466_v57 = vpop.eup %3465  ;;  %3485 = vrcp.f32 %v307_v53  ;;  %v339_v58 = vadd.f32 1.0, %v3464_v54  ;;  %v84_v3 = vld [vmem:[%s4784_s1 + $0x130] sm:$0xff]  ;;  %v3025_v6 = vmul.f32 -1.442695, %v52_v60  ;;  %v85_v7 = vld [vmem:[%s4784_s1 + $0x138] sm:$0xff]  ;;  %v71_v14 = vld [vmem:[%s4784_s1 + $0xc8] sm:$0xff] }
  0x34   :  { %v3468_v61 = vpop.eup %3467  ;;  %3487 = vrcp.f32 %v338_v55  ;;  %v324_v62 = vadd.f32 1.0, %v3466_v57  ;;  %v3026_v9 = vmul.f32 -1.442695, %v53_v63  ;;  %v3057_v13 = vmul.f32 -1.442695, %v84_v3  ;;  %v102_v17 = vld [vmem:[%s4784_s1 + $0x1c0] sm:$0xff] }
  0x35   :  { %v3470_v0 = vpop.eup %3469  ;;  %v495_v1 = vpack.c.bf16 %v3468_v61, %v3444_v34  ;;  %3489 = vrcp.f32 %v339_v58  ;;  %v3058_v16 = vmul.f32 -1.442695, %v85_v7  ;;  %v3043_v20 = vmul.f32 -1.442695, %v70_v10  ;;  %v103_v21 = vld [vmem:[%s4784_s1 + $0x1c8] sm:$0xff]  ;;  %v54_v24 = vld [vmem:[%s4784_s1 + $0x40] sm:$0xff] }
  0x36   :  { %v3472_v4 = vpop.eup %3471  ;;  %v325_v5 = vadd.f32 1.0, %v3470_v0  ;;  %3491 = vrcp.f32 %v324_v62  ;;  %v3044_v23 = vmul.f32 -1.442695, %v71_v14  ;;  %v3075_v27 = vmul.f32 -1.442695, %v102_v17  ;;  %v55_v28 = vld [vmem:[%s4784_s1 + $0x48] sm:$0xff] }
  0x37   :  { %v3474_v8 = vpop.eup %3473  ;;  %564 = vperm.xlu0 %3353, %v495_v1   ;;  %3493 = vpow2.f32 %v3073_v59  ;;  %v3076_v30 = vmul.f32 -1.442695, %v103_v21  ;;  %v3027_v33 = vmul.f32 -1.442695, %v54_v24  ;;  %v86_v34 = vld [vmem:[%s4784_s1 + $0x140] sm:$0xff]  ;;  %v87_v59 = vld [vmem:[%s4784_s1 + $0x148] sm:$0xff] }
  0x38   :  { %v3476_v11 = vpop.eup %3475  ;;  %v511_v12 = vpack.c.bf16 %v3474_v8, %v3472_v4  ;;  %3495 = vrcp.f32 %v325_v5  ;;  %v3028_v36 = vmul.f32 -1.442695, %v55_v28  ;;  %v3059_v40 = vmul.f32 -1.442695, %v86_v34  ;;  %v72_v0 = vld [vmem:[%s4784_s1 + $0xd0] sm:$0xff]  ;;  %v73_v4 = vld [vmem:[%s4784_s1 + $0xd8] sm:$0xff] }
  0x39   :  { %v3478_v15 = vpop.eup %3477  ;;  %3497 = vpow2.f32 %v3074_v2  ;;  %v3060_v3 = vmul.f32 -1.442695, %v87_v59  ;;  %v104_v7 = vld [vmem:[%s4784_s1 + $0x1d0] sm:$0xff]  ;;  %v105_v10 = vld [vmem:[%s4784_s1 + $0x1d8] sm:$0xff]  ;;  %v74_v28 = vld [vmem:[%s4784_s1 + $0xe0] sm:$0xff] }
  0x3a   :  { %v3480_v18 = vpop.eup %3479  ;;  %1502 = vperm.xlu1 %3354, %v511_v12   ;;  %v504_v19 = vpack.c.bf16 %v3478_v15, %v3476_v11  ;;  %3499 = vpow2.f32 %v3025_v6  ;;  %v56_v14 = vld [vmem:[%s4784_s1 + $0x50] sm:$0xff]  ;;  %v3077_v17 = vmul.f32 -1.442695, %v104_v7  ;;  %v59_v7 = vld [vmem:[%s4784_s1 + $0x68] sm:$0xff] }
  0x3b   :  { %v3482_v22 = vpop.eup %3481  ;;  %3501 = vpow2.f32 %v3026_v9  ;;  %v3045_v9 = vmul.f32 -1.442695, %v72_v0  ;;  %v88_v21 = vld [vmem:[%s4784_s1 + $0x150] sm:$0xff]  ;;  %v3029_v24 = vmul.f32 -1.442695, %v56_v14  ;;  %v91_v14 = vld [vmem:[%s4784_s1 + $0x168] sm:$0xff] }
  0x3c   :  { %v3484_v25 = vpop.eup %3483  ;;  %600 = vperm.xlu0 %3353, %v504_v19   ;;  %v520_v26 = vpack.c.bf16 %v3482_v22, %v3480_v18  ;;  %3503 = vpow2.f32 %v3057_v13  ;;  %v3046_v13 = vmul.f32 -1.442695, %v73_v4  ;;  %v57_v18 = vld [vmem:[%s4784_s1 + $0x58] sm:$0xff] }
  0x3d   :  { %v3486_v29 = vpop.eup %3485  ;;  %3505 = vpow2.f32 %v3058_v16 }
  0x3e   :  { %v3488_v31 = vpop.eup %3487  ;;  %1538 = vperm.xlu1 %3354, %v520_v26   ;;  %v496_v32 = vpack.c.bf16 %v3486_v29, %v3484_v25  ;;  %3507 = vpow2.f32 %v3043_v20  ;;  %v3078_v20 = vmul.f32 -1.442695, %v105_v10  ;;  %v89_v25 = vld [vmem:[%s4784_s1 + $0x158] sm:$0xff] }
  0x3f   :  { %v3490_v35 = vpop.eup %3489  ;;  %3509 = vpow2.f32 %v3044_v23  ;;  %v3062_v34 = vmul.f32 -1.442695, %v89_v25  ;;  %v108_v25 = vld [vmem:[%s4784_s1 + $0x1f0] sm:$0xff] }
  0x40   :  { %v3492_v37 = vpop.eup %3491  ;;  %568 = vperm.xlu0 %3353, %v496_v32   ;;  %v512_v38 = vpack.c.bf16 %v3490_v35, %v3488_v31  ;;  %3511 = vpow2.f32 %v3075_v27  ;;  %v3030_v27 = vmul.f32 -1.442695, %v57_v18  ;;  %v3061_v31 = vmul.f32 -1.442695, %v88_v21  ;;  %v75_v32 = vld [vmem:[%s4784_s1 + $0xe8] sm:$0xff]  ;;  %v106_v35 = vld [vmem:[%s4784_s1 + $0x1e0] sm:$0xff] }
  0x41   :  { %v3494_v39 = vpop.eup %3493  ;;  %3513 = vpow2.f32 %v3076_v30  ;;  %v76_v18 = vld [vmem:[%s4784_s1 + $0xf0] sm:$0xff] }
  0x42   :  { %v3496_v41 = vpop.eup %3495  ;;  %1506 = vperm.xlu1 %3354, %v512_v38   ;;  %v356_v42 = vadd.f32 1.0, %v3494_v39  ;;  %3515 = vpow2.f32 %v3027_v33  ;;  %v3047_v38 = vmul.f32 -1.442695, %v74_v28  ;;  %v3049_v28 = vmul.f32 -1.442695, %v76_v18 }
  0x43   :  { %v3498_v43 = vpop.eup %3497  ;;  %v505_v44 = vpack.c.bf16 %v3496_v41, %v3492_v37  ;;  %3517 = vpow2.f32 %v3028_v36  ;;  %v107_v41 = vld [vmem:[%s4784_s1 + $0x1e8] sm:$0xff] }
  0x44   :  { %v3500_v45 = vpop.eup %3499  ;;  %v357_v46 = vadd.f32 1.0, %v3498_v43  ;;  %3519 = vrcp.f32 %v356_v42 }
  0x45   :  { %v3502_v47 = vpop.eup %3501  ;;  %604 = vperm.xlu0 %3353, %v505_v44   ;;  %v308_v48 = vadd.f32 1.0, %v3500_v45  ;;  %3521 = vpow2.f32 %v3059_v40  ;;  %v3048_v40 = vmul.f32 -1.442695, %v75_v32  ;;  %v3079_v44 = vmul.f32 -1.442695, %v106_v35  ;;  %v60_v32 = vld [vmem:[%s4784_s1 + $0x70] sm:$0xff] }
  0x46   :  { %v3504_v49 = vpop.eup %3503  ;;  %3523 = vrcp.f32 %v357_v46  ;;  %v309_v50 = vadd.f32 1.0, %v3502_v47  ;;  %v3081_v35 = vmul.f32 -1.442695, %v108_v25 }
  0x47   :  { %v3506_v51 = vpop.eup %3505  ;;  %3525 = vrcp.f32 %v308_v48  ;;  %v340_v52 = vadd.f32 1.0, %v3504_v49  ;;  %v3080_v48 = vmul.f32 -1.442695, %v107_v41 }
  0x48   :  { %v3508_v53 = vpop.eup %3507  ;;  %3527 = vrcp.f32 %v309_v50  ;;  %v341_v54 = vadd.f32 1.0, %v3506_v51 }
  0x49   :  { %v3510_v55 = vpop.eup %3509  ;;  %3529 = vrcp.f32 %v340_v52  ;;  %v326_v56 = vadd.f32 1.0, %v3508_v53 }
  0x4a   :  { %v3512_v57 = vpop.eup %3511  ;;  %3531 = vrcp.f32 %v341_v54  ;;  %v327_v58 = vadd.f32 1.0, %v3510_v55 }
  0x4b   :  { %v3514_v60 = vpop.eup %3513  ;;  %3533 = vrcp.f32 %v326_v56  ;;  %v358_v61 = vadd.f32 1.0, %v3512_v57 }
  0x4c   :  { %v3516_v62 = vpop.eup %3515  ;;  %3535 = vrcp.f32 %v327_v58  ;;  %v359_v63 = vadd.f32 1.0, %v3514_v60 }
  0x4d   :  { %v3518_v1 = vpop.eup %3517  ;;  %3537 = vrcp.f32 %v358_v61  ;;  %v310_v2 = vadd.f32 1.0, %v3516_v62 }
  0x4e   :  { %v3520_v5 = vpop.eup %3519  ;;  %3539 = vrcp.f32 %v359_v63  ;;  %v311_v6 = vadd.f32 1.0, %v3518_v1 }
  0x4f   :  { %v3522_v8 = vpop.eup %3521  ;;  %3541 = vrcp.f32 %v310_v2  ;;  %v58_v2 = vld [vmem:[%s4784_s1 + $0x60] sm:$0xff] }
  0x50   :  { %v3524_v11 = vpop.eup %3523  ;;  %3543 = vrcp.f32 %v311_v6  ;;  %v342_v12 = vadd.f32 1.0, %v3522_v8  ;;  %v3031_v10 = vmul.f32 -1.442695, %v58_v2 }
  0x51   :  { %v3526_v15 = vpop.eup %3525  ;;  %v521_v16 = vpack.c.bf16 %v3524_v11, %v3520_v5  ;;  %3545 = vpow2.f32 %v3060_v3  ;;  %v90_v11 = vld [vmem:[%s4784_s1 + $0x160] sm:$0xff] }
  0x52   :  { %v3528_v19 = vpop.eup %3527  ;;  %3547 = vrcp.f32 %v342_v12  ;;  %v3063_v21 = vmul.f32 -1.442695, %v90_v11 }
  0x53   :  { %v3530_v22 = vpop.eup %3529  ;;  %1542 = vperm.xlu1 %3354, %v521_v16   ;;  %v497_v23 = vpack.c.bf16 %v3528_v19, %v3526_v15  ;;  %3549 = vpow2.f32 %v3045_v9 }
  0x54   :  { %v3532_v26 = vpop.eup %3531  ;;  %3551 = vpow2.f32 %v3046_v13 }
  0x55   :  { %v3534_v29 = vpop.eup %3533  ;;  %572 = vperm.xlu0 %3353, %v497_v23   ;;  %v513_v30 = vpack.c.bf16 %v3532_v26, %v3530_v22  ;;  %3553 = vpow2.f32 %v3077_v17  ;;  %v3032_v17 = vmul.f32 -1.442695, %v59_v7  ;;  %v77_v22 = vld [vmem:[%s4784_s1 + $0xf8] sm:$0xff] }
  0x56   :  { %v3536_v33 = vpop.eup %3535  ;;  %3555 = vpow2.f32 %v3078_v20 }
  0x57   :  { %v3538_v36 = vpop.eup %3537  ;;  %1510 = vperm.xlu1 %3354, %v513_v30   ;;  %v506_v37 = vpack.c.bf16 %v3536_v33, %v3534_v29  ;;  %3557 = vpow2.f32 %v3029_v24  ;;  %v3064_v24 = vmul.f32 -1.442695, %v91_v14  ;;  %v109_v29 = vld [vmem:[%s4784_s1 + $0x1f8] sm:$0xff] }
  0x58   :  { %v3540_v39 = vpop.eup %3539  ;;  %3559 = vpow2.f32 %v3030_v27 }
  0x59   :  { %v3542_v42 = vpop.eup %3541  ;;  %608 = vperm.xlu0 %3353, %v506_v37   ;;  %v522_v43 = vpack.c.bf16 %v3540_v39, %v3538_v36  ;;  %3561 = vpow2.f32 %v3061_v31  ;;  %v3050_v31 = vmul.f32 -1.442695, %v77_v22  ;;  %v61_v36 = vld [vmem:[%s4784_s1 + $0x78] sm:$0xff]  ;;  %v92_v39 = vld [vmem:[%s4784_s1 + $0x170] sm:$0xff] }
  0x5a   :  { %v3544_v45 = vpop.eup %3543  ;;  %3563 = vpow2.f32 %v3062_v34 }
  0x5b   :  { %v3546_v46 = vpop.eup %3545  ;;  %1546 = vperm.xlu1 %3354, %v522_v43   ;;  %v498_v47 = vpack.c.bf16 %v3544_v45, %v3542_v42  ;;  %3565 = vpow2.f32 %v3047_v38  ;;  %v3082_v38 = vmul.f32 -1.442695, %v109_v29  ;;  %v3033_v42 = vmul.f32 -1.442695, %v60_v32  ;;  %v93_v43 = vld [vmem:[%s4784_s1 + $0x178] sm:$0xff] }
  0x5c   :  { %v3548_v49 = vpop.eup %3547  ;;  %v343_v50 = vadd.f32 1.0, %v3546_v46  ;;  %3567 = vpow2.f32 %v3048_v40  ;;  %v3034_v45 = vmul.f32 -1.442695, %v61_v36  ;;  %v3721_v36 = vmov 1985246804  }
  0x5d   :  { %v3550_v51 = vpop.eup %3549  ;;  %576 = vperm.xlu0 %3353, %v498_v47   ;;  %3569 = vpow2.f32 %v3079_v44 }
  0x5e   :  { %v3552_v52 = vpop.eup %3551  ;;  %3571 = vrcp.f32 %v343_v50  ;;  %v328_v53 = vadd.f32 1.0, %v3550_v51  ;;  %v3066_v50 = vmul.f32 -1.442695, %v93_v43 }
  0x5f   :  { %v3554_v54 = vpop.eup %3553  ;;  %v329_v55 = vadd.f32 1.0, %v3552_v52  ;;  %3573 = vpow2.f32 %v3080_v48  ;;  %v3065_v48 = vmul.f32 -1.442695, %v92_v39 }
  0x60   :  { %v3556_v56 = vpop.eup %3555  ;;  %3575 = vrcp.f32 %v328_v53  ;;  %v360_v57 = vadd.f32 1.0, %v3554_v54 }
  0x61   :  { %v3558_v58 = vpop.eup %3557  ;;  %3577 = vrcp.f32 %v329_v55  ;;  %v361_v59 = vadd.f32 1.0, %v3556_v56 }
  0x62   :  { %v3560_v60 = vpop.eup %3559  ;;  %3579 = vrcp.f32 %v360_v57  ;;  %v312_v61 = vadd.f32 1.0, %v3558_v58 }
  0x63   :  { %v3562_v62 = vpop.eup %3561  ;;  %3581 = vrcp.f32 %v361_v59  ;;  %v313_v63 = vadd.f32 1.0, %v3560_v60 }
  0x64   :  { %v3564_v0 = vpop.eup %3563  ;;  %3583 = vrcp.f32 %v312_v61  ;;  %v344_v1 = vadd.f32 1.0, %v3562_v62 }
  0x65   :  { %v3566_v3 = vpop.eup %3565  ;;  %3585 = vrcp.f32 %v313_v63  ;;  %v345_v4 = vadd.f32 1.0, %v3564_v0 }
  0x66   :  { %v3568_v5 = vpop.eup %3567  ;;  %3587 = vrcp.f32 %v344_v1  ;;  %v330_v6 = vadd.f32 1.0, %v3566_v3 }
  0x67   :  { %v3570_v8 = vpop.eup %3569  ;;  %3589 = vrcp.f32 %v345_v4  ;;  %v331_v9 = vadd.f32 1.0, %v3568_v5 }
  0x68   :  { %v3572_v12 = vpop.eup %3571  ;;  %3591 = vrcp.f32 %v330_v6  ;;  %v362_v13 = vadd.f32 1.0, %v3570_v8 }
  0x69   :  { %v3574_v15 = vpop.eup %3573  ;;  %v514_v16 = vpack.c.bf16 %v3572_v12, %v3548_v49  ;;  %3593 = vrcp.f32 %v331_v9 }
  0x6a   :  { %v3576_v19 = vpop.eup %3575  ;;  %v363_v20 = vadd.f32 1.0, %v3574_v15  ;;  %3595 = vrcp.f32 %v362_v13 }
  0x6b   :  { %v3578_v23 = vpop.eup %3577  ;;  %1514 = vperm.xlu1 %3354, %v514_v16   ;;  %3597 = vpow2.f32 %v3031_v10 }
  0x6c   :  { %v3580_v26 = vpop.eup %3579  ;;  %v507_v27 = vpack.c.bf16 %v3578_v23, %v3576_v19  ;;  %3599 = vrcp.f32 %v363_v20 }
  0x6d   :  { %v3582_v30 = vpop.eup %3581  ;;  %3601 = vpow2.f32 %v3032_v17 }
  0x6e   :  { %v3584_v33 = vpop.eup %3583  ;;  %612 = vperm.xlu0 %3353, %v507_v27   ;;  %v523_v34 = vpack.c.bf16 %v3582_v30, %v3580_v26  ;;  %3603 = vpow2.f32 %v3063_v21 }
  0x6f   :  { %v3586_v37 = vpop.eup %3585  ;;  %3605 = vpow2.f32 %v3064_v24 }
  0x70   :  { %v3588_v40 = vpop.eup %3587  ;;  %1550 = vperm.xlu1 %3354, %v523_v34   ;;  %v499_v41 = vpack.c.bf16 %v3586_v37, %v3584_v33  ;;  %3607 = vpow2.f32 %v3049_v28  ;;  %v3720_v33 = vmov 839922192   ;;  %v646_v37 = vunpack.c.l.s4 %v3721_v36  ;;  %v3126_v36 = vld [vmem:[%s4783_s0 + $0x8c] sm:$0xf] }
  0x71   :  { %v3590_v44 = vpop.eup %3589  ;;  %3609 = vpow2.f32 %v3050_v31  ;;  %v639_v34 = vunpack.c.l.s4 %v3720_v33 }
  0x72   :  { %v3592_v46 = vpop.eup %3591  ;;  %580 = vperm.xlu0 %3353, %v499_v41   ;;  %v515_v47 = vpack.c.bf16 %v3590_v44, %v3588_v40  ;;  %3611 = vpow2.f32 %v3081_v35  ;;  %v641_v35 = vlaneseq  ;;  %v647_v40 = vunpack.c.0.s8 %v646_v37  ;;  %v3357_v41 = vld [vmem:[%s4785_s2 + $0x4] ss:$8 sps:$4 sm:$0xff]  }
  0x73   :  { %v3594_v49 = vpop.eup %3593  ;;  %3613 = vpow2.f32 %v3082_v38  ;;  %v640_v38 = vunpack.c.0.s8 %v639_v34  ;;  %1174 = vmatprep.mubr.bf16.mxu0 %v3357_v41  ;;  %1992 = vmatprep.mubr.bf16.mxu1 %v3357_v41  ;;  %v547_v41 = vld [vmem:[%s4783_s0 + $0x54] sm:$0xf] }
  0x74   :  { %v3596_v51 = vpop.eup %3595  ;;  %1518 = vperm.xlu1 %3354, %v515_v47   ;;  %v508_v52 = vpack.c.bf16 %v3594_v49, %v3592_v46  ;;  %3615 = vpow2.f32 %v3033_v42  ;;  %v642_v39 = vshrl.u32 %v641_v35, 7  ;;  %v543_v46 = vld [vmem:[%s4783_s0 + $0x44] sm:$0xf]  ;;  %v3125_v35 = vld [vmem:[%s4783_s0 + $0x88] sm:$0xf] }
  0x75   :  { %v3598_v53 = vpop.eup %3597  ;;  %3617 = vpow2.f32 %v3034_v45  ;;  %v542_v45 = vld [vmem:[%s4783_s0 + $0x40] sm:$0xf] }
  0x76   :  { %v3600_v54 = vpop.eup %3599  ;;  %616 = vperm.xlu0 %3353, %v508_v52   ;;  %v314_v55 = vadd.f32 1.0, %v3598_v53  ;;  %3619 = vpow2.f32 %v3065_v48  ;;  %v3950_v42 = vsub.s32 %v640_v38, %v642_v39  ;;  %v3952_v43 = vsub.s32 %v647_v40, %v642_v39  ;;  %v546_v40 = vld [vmem:[%s4783_s0 + $0x50] sm:$0xf] }
  0x77   :  { %v3602_v56 = vpop.eup %3601  ;;  %v524_v57 = vpack.c.bf16 %v3600_v54, %v3596_v51  ;;  %3621 = vpow2.f32 %v3066_v50  ;;  %v526_v50 = vld [vmem:[%s4783_s0] sm:$0xf] }
  0x78   :  { %v3604_v58 = vpop.eup %3603  ;;  %v315_v59 = vadd.f32 1.0, %v3602_v56  ;;  %3623 = vrcp.f32 %v314_v55  ;;  %v527_v55 = vld [vmem:[%s4783_s0 + $0x4] sm:$0xf] }
  0x79   :  { %v3606_v60 = vpop.eup %3605  ;;  %1554 = vperm.xlu1 %3354, %v524_v57   ;;  %v346_v61 = vadd.f32 1.0, %v3604_v58  ;;  %v3139_v57 = vld [vmem:[%s4783_s0 + $0xc0] sm:$0xf]  ;;  %v3140_v58 = vld [vmem:[%s4783_s0 + $0xc4] sm:$0xf] }
  0x7a   :  { %v3608_v62 = vpop.eup %3607  ;;  %3625 = vrcp.f32 %v315_v59  ;;  %v347_v63 = vadd.f32 1.0, %v3606_v60 }
  0x7b   :  { %v3610_v0 = vpop.eup %3609  ;;  %3627 = vrcp.f32 %v346_v61  ;;  %v332_v1 = vadd.f32 1.0, %v3608_v62 }
  0x7c   :  { %v3612_v2 = vpop.eup %3611  ;;  %3629 = vrcp.f32 %v347_v63  ;;  %v333_v3 = vadd.f32 1.0, %v3610_v0 }
  0x7d   :  { %v3614_v4 = vpop.eup %3613  ;;  %3631 = vrcp.f32 %v332_v1  ;;  %v364_v5 = vadd.f32 1.0, %v3612_v2  ;;  %v3123_v1 = vld [vmem:[%s4783_s0 + $0x80] sm:$0xf] }
  0x7e   :  { %v3616_v6 = vpop.eup %3615  ;;  %3633 = vrcp.f32 %v333_v3  ;;  %v365_v7 = vadd.f32 1.0, %v3614_v4 }
  0x7f   :  { %v3618_v8 = vpop.eup %3617  ;;  %3635 = vrcp.f32 %v364_v5  ;;  %v316_v9 = vadd.f32 1.0, %v3616_v6  ;;  %v3124_v6 = vld [vmem:[%s4783_s0 + $0x84] sm:$0xf] }
  0x80   :  { %v3620_v10 = vpop.eup %3619  ;;  %3637 = vrcp.f32 %v365_v7  ;;  %v317_v11 = vadd.f32 1.0, %v3618_v8  ;;  %v544_v7 = vld [vmem:[%s4783_s0 + $0x48] sm:$0xf]  ;;  %v545_v8 = vld [vmem:[%s4783_s0 + $0x4c] sm:$0xf] }
  0x81   :  { %v3622_v12 = vpop.eup %3621  ;;  %3639 = vrcp.f32 %v316_v9  ;;  %v348_v13 = vadd.f32 1.0, %v3620_v10 }
  0x82   :  { %v3624_v14 = vpop.eup %3623  ;;  %3641 = vrcp.f32 %v317_v11  ;;  %v349_v15 = vadd.f32 1.0, %v3622_v12 }
  0x83   :  { %3643 = vrcp.f32 %v348_v13 }
  0x84   :  { %v3626_v16 = vpop.eup %3625  ;;  %3645 = vrcp.f32 %v349_v15  ;;  %v3141_v15 = vld [vmem:[%s4783_s0 + $0xc8] sm:$0xf] }
  0x85   :  { %v3628_v17 = vpop.eup %3627  ;;  %v500_v18 = vpack.c.bf16 %v3626_v16, %v3624_v14  ;;  %v3142_v16 = vld [vmem:[%s4783_s0 + $0xcc] sm:$0xf] }
  0x86   :  { %v3630_v19 = vpop.eup %3629 }
  0x87   :  { %v3632_v20 = vpop.eup %3631  ;;  %584 = vperm.xlu0 %3353, %v500_v18   ;;  %v516_v21 = vpack.c.bf16 %v3630_v19, %v3628_v17 }
  0x88   :  { %v3634_v22 = vpop.eup %3633 }
  0x89   :  { %v3636_v23 = vpop.eup %3635  ;;  %1522 = vperm.xlu1 %3354, %v516_v21   ;;  %v509_v24 = vpack.c.bf16 %v3634_v22, %v3632_v20 }
  0x8a   :  { %v3638_v25 = vpop.eup %3637 }
  0x8b   :  { %v3640_v26 = vpop.eup %3639  ;;  %620 = vperm.xlu0 %3353, %v509_v24   ;;  %v525_v27 = vpack.c.bf16 %v3638_v25, %v3636_v23 }
  0x8c   :  { %v3642_v28 = vpop.eup %3641 }
  0x8d   :  { %v3644_v29 = vpop.eup %3643  ;;  %1558 = vperm.xlu1 %3354, %v525_v27   ;;  %v501_v30 = vpack.c.bf16 %v3642_v28, %v3640_v26  ;;  %v528_v28 = vld [vmem:[%s4783_s0 + $0x8] sm:$0xf] }
  0x8e   :  { %v3646_v31 = vpop.eup %3645 }
  0x8f   :  { %588 = vperm.xlu0 %3353, %v501_v30   ;;  %v517_v32 = vpack.c.bf16 %v3646_v31, %v3644_v29  ;;  %v529_v29 = vld [vmem:[%s4783_s0 + $0xc] sm:$0xf] }
  0x91   :  { %1526 = vperm.xlu1 %3354, %v517_v32  }
  0x9e   :  { %v593_v44 = vpop.permute.xlu0 %592 }
  0x9f   :  { %v756_v47 = vrot.slane %v593_v44, %v3950_v42  ;;  %v763_v48 = vrot.slane %v593_v44, %v3952_v43 }
  0xa0   :  { %v561_v49 = vpop.permute.xlu1 %560 }
  0xa1   :  { %v644_v51 = vrot.slane %v561_v49, %v3950_v42  ;;  %v651_v52 = vrot.slane %v561_v49, %v3952_v43  ;;  %v910_v53 = vmul.bf16 %v756_v47, %v542_v45  ;;  %v911_v54 = vmul.bf16 %v763_v48, %v543_v46 }
  0xa2   :  { %v1531_v56 = vpop.permute.xlu0 %1530 }
  0xa3   :  { %v1694_v59 = vrot.slane %v1531_v56, %v3950_v42  ;;  %v1701_v60 = vrot.slane %v1531_v56, %v3952_v43  ;;  %v3115_v61 = vcombine.low %v910_v53, %v911_v54  ;;  %v894_v62 = vmul.bf16 %v644_v51, %v526_v50  ;;  %v3143_v50 = vld [vmem:[%s4783_s0 + $0xd0] sm:$0xf]  ;;  %v3144_v51 = vld [vmem:[%s4783_s0 + $0xd4] sm:$0xf] }
  0xa4   :  { %v1499_v63 = vpop.permute.xlu1 %1498  ;;  %v895_v0 = vmul.bf16 %v651_v52, %v527_v55 }
  0xa5   :  { %v1582_v2 = vrot.slane %v1499_v63, %v3950_v42  ;;  %v1589_v3 = vrot.slane %v1499_v63, %v3952_v43  ;;  %3171 = vmatprep.subr.bf16.mxu0 %v3115_v61  ;;  %v1848_v4 = vmul.bf16 %v3139_v57, %v1694_v59  ;;  %v1849_v5 = vmul.bf16 %v3140_v58, %v1701_v60  ;;  %v530_v58 = vld [vmem:[%s4783_s0 + $0x10] sm:$0xf]  ;;  %v531_v59 = vld [vmem:[%s4783_s0 + $0x14] sm:$0xf] }
  0xa6   :  { %v597_v9 = vpop.permute.xlu0 %596  ;;  %v3107_v10 = vcombine.low %v894_v62, %v895_v0 }
  0xa7   :  { %v770_v11 = vrot.slane %v597_v9, %v3950_v42  ;;  %v777_v12 = vrot.slane %v597_v9, %v3952_v43  ;;  %v3163_v13 = vcombine.low %v1848_v4, %v1849_v5  ;;  %v1832_v14 = vmul.bf16 %v3123_v1, %v1582_v2  ;;  %v3127_v1 = vld [vmem:[%s4783_s0 + $0x90] sm:$0xf]  ;;  %v3128_v2 = vld [vmem:[%s4783_s0 + $0x94] sm:$0xf] }
  0xa8   :  { %v1535_v17 = vpop.permute.xlu1 %1534  ;;  %3172 = vmatpush3.bf16.msra.mxu0 %v3107_v10  ;;  %v1833_v18 = vmul.bf16 %v3124_v6, %v1589_v3 }
  0xa9   :  { %v912_v19 = vmul.bf16 %v770_v11, %v544_v7  ;;  %v913_v20 = vmul.bf16 %v777_v12, %v545_v8  ;;  %v1708_v21 = vrot.slane %v1535_v17, %v3950_v42  ;;  %v1715_v22 = vrot.slane %v1535_v17, %v3952_v43  ;;  %3259 = vmatprep.subr.bf16.mxu1 %v3163_v13  ;;  %v548_v12 = vld [vmem:[%s4783_s0 + $0x58] sm:$0xf]  ;;  %v549_v13 = vld [vmem:[%s4783_s0 + $0x5c] sm:$0xf] }
  0xaa   :  { %v3155_v23 = vcombine.low %v1832_v14, %v1833_v18 }
  0xab   :  { %v1850_v24 = vmul.bf16 %v3141_v15, %v1708_v21  ;;  %v1851_v25 = vmul.bf16 %v3142_v16, %v1715_v22  ;;  %v3116_v26 = vcombine.low %v912_v19, %v913_v20  ;;  %v3145_v22 = vld [vmem:[%s4783_s0 + $0xd8] sm:$0xf] }
  0xac   :  { %3260 = vmatpush3.bf16.msra.mxu1 %v3155_v23  ;;  %v3146_v23 = vld [vmem:[%s4783_s0 + $0xdc] sm:$0xf] }
  0xad   :  { %3173 = vmatprep.subr.bf16.mxu0 %v3116_v26  ;;  %v3164_v27 = vcombine.low %v1850_v24, %v1851_v25 }
  0xaf   :  { %3261 = vmatprep.subr.bf16.mxu1 %v3164_v27  ;;  %v532_v27 = vld [vmem:[%s4783_s0 + $0x18] sm:$0xf] }
  0xb6   :  { %v565_v30 = vpop.permute.xlu0 %564 }
  0xb7   :  { %v658_v31 = vrot.slane %v565_v30, %v3950_v42  ;;  %v665_v32 = vrot.slane %v565_v30, %v3952_v43 }
  0xb9   :  { %v896_v33 = vmul.bf16 %v658_v31, %v528_v28  ;;  %v897_v34 = vmul.bf16 %v665_v32, %v529_v29  ;;  %v1503_v37 = vpop.permute.xlu1 %1502  ;;  %v533_v28 = vld [vmem:[%s4783_s0 + $0x1c] sm:$0xf] }
  0xba   :  { %v1596_v38 = vrot.slane %v1503_v37, %v3950_v42  ;;  %v1603_v39 = vrot.slane %v1503_v37, %v3952_v43 }
  0xbb   :  { %v601_v44 = vpop.permute.xlu0 %600  ;;  %v3108_v45 = vcombine.low %v896_v33, %v897_v34  ;;  %v3129_v34 = vld [vmem:[%s4783_s0 + $0x98] sm:$0xf] }
  0xbc   :  { %v1834_v46 = vmul.bf16 %v3125_v35, %v1596_v38  ;;  %v1835_v47 = vmul.bf16 %v3126_v36, %v1603_v39  ;;  %v784_v48 = vrot.slane %v601_v44, %v3950_v42  ;;  %v791_v49 = vrot.slane %v601_v44, %v3952_v43  ;;  %v3130_v35 = vld [vmem:[%s4783_s0 + $0x9c] sm:$0xf]  ;;  %v550_v44 = vld [vmem:[%s4783_s0 + $0x60] sm:$0xf] }
  0xbd   :  { %v1539_v52 = vpop.permute.xlu1 %1538  ;;  %3174 = vmatpush3.bf16.msra.mxu0 %v3108_v45  ;;  %v551_v45 = vld [vmem:[%s4783_s0 + $0x64] sm:$0xf] }
  0xbe   :  { %v914_v53 = vmul.bf16 %v784_v48, %v546_v40  ;;  %v915_v54 = vmul.bf16 %v791_v49, %v547_v41  ;;  %v1722_v55 = vrot.slane %v1539_v52, %v3950_v42  ;;  %v1729_v56 = vrot.slane %v1539_v52, %v3952_v43  ;;  %v3148_v52 = vld [vmem:[%s4783_s0 + $0xe4] sm:$0xf] }
  0xbf   :  { %v3156_v57 = vcombine.low %v1834_v46, %v1835_v47  ;;  %v569_v60 = vpop.permute.xlu0 %568 }
  0xc0   :  { %v1852_v61 = vmul.bf16 %v3143_v50, %v1722_v55  ;;  %v1853_v62 = vmul.bf16 %v3144_v51, %v1729_v56  ;;  %v672_v63 = vrot.slane %v569_v60, %v3950_v42  ;;  %v679_v0 = vrot.slane %v569_v60, %v3952_v43  ;;  %v3147_v51 = vld [vmem:[%s4783_s0 + $0xe0] sm:$0xf] }
  0xc1   :  { %3262 = vmatpush3.bf16.msra.mxu1 %v3156_v57  ;;  %v1507_v3 = vpop.permute.xlu1 %1506  ;;  %v3117_v4 = vcombine.low %v914_v53, %v915_v54  ;;  %v534_v60 = vld [vmem:[%s4783_s0 + $0x20] sm:$0xf] }
  0xc2   :  { %v898_v5 = vmul.bf16 %v672_v63, %v530_v58  ;;  %v899_v6 = vmul.bf16 %v679_v0, %v531_v59  ;;  %v1610_v7 = vrot.slane %v1507_v3, %v3950_v42  ;;  %v1617_v8 = vrot.slane %v1507_v3, %v3952_v43 }
  0xc3   :  { %3175 = vmatprep.subr.bf16.mxu0 %v3117_v4  ;;  %v3165_v9 = vcombine.low %v1852_v61, %v1853_v62  ;;  %v535_v61 = vld [vmem:[%s4783_s0 + $0x24] sm:$0xf] }
  0xc4   :  { %v1836_v10 = vmul.bf16 %v3127_v1, %v1610_v7  ;;  %v1837_v11 = vmul.bf16 %v3128_v2, %v1617_v8  ;;  %v605_v14 = vpop.permute.xlu0 %604  ;;  %v3109_v15 = vcombine.low %v898_v5, %v899_v6  ;;  %v3131_v8 = vld [vmem:[%s4783_s0 + $0xa0] sm:$0xf] }
  0xc5   :  { %3263 = vmatprep.subr.bf16.mxu1 %v3165_v9  ;;  %v798_v16 = vrot.slane %v605_v14, %v3950_v42  ;;  %v805_v17 = vrot.slane %v605_v14, %v3952_v43  ;;  %v3132_v9 = vld [vmem:[%s4783_s0 + $0xa4] sm:$0xf] }
  0xc6   :  { %3176 = vmatpush3.bf16.msra.mxu0 %v3109_v15  ;;  %v3157_v18 = vcombine.low %v1836_v10, %v1837_v11  ;;  %v552_v15 = vld [vmem:[%s4783_s0 + $0x68] sm:$0xf] }
  0xc7   :  { %v916_v19 = vmul.bf16 %v798_v16, %v548_v12  ;;  %v917_v20 = vmul.bf16 %v805_v17, %v549_v13  ;;  %v553_v16 = vld [vmem:[%s4783_s0 + $0x6c] sm:$0xf] }
  0xc8   :  { %3264 = vmatpush3.bf16.msra.mxu1 %v3157_v18 }
  0xc9   :  { %v3118_v21 = vcombine.low %v916_v19, %v917_v20  ;;  %v3149_v20 = vld [vmem:[%s4783_s0 + $0xe8] sm:$0xf] }
  0xcb   :  { %3177 = vmatprep.subr.bf16.mxu0 %v3118_v21  ;;  %v3150_v21 = vld [vmem:[%s4783_s0 + $0xec] sm:$0xf] }
  0xd2   :  { %v1543_v24 = vpop.permute.xlu1 %1542 }
  0xd3   :  { %v1736_v25 = vrot.slane %v1543_v24, %v3950_v42  ;;  %v1743_v26 = vrot.slane %v1543_v24, %v3952_v43 }
  0xd4   :  { %v573_v29 = vpop.permute.xlu0 %572 }
  0xd5   :  { %v1854_v30 = vmul.bf16 %v3145_v22, %v1736_v25  ;;  %v1855_v31 = vmul.bf16 %v3146_v23, %v1743_v26  ;;  %v686_v32 = vrot.slane %v573_v29, %v3950_v42  ;;  %v693_v33 = vrot.slane %v573_v29, %v3952_v43  ;;  %v537_v29 = vld [vmem:[%s4783_s0 + $0x2c] sm:$0xf] }
  0xd6   :  { %v1511_v36 = vpop.permute.xlu1 %1510 }
  0xd7   :  { %v900_v37 = vmul.bf16 %v686_v32, %v532_v27  ;;  %v901_v38 = vmul.bf16 %v693_v33, %v533_v28  ;;  %v1624_v39 = vrot.slane %v1511_v36, %v3950_v42  ;;  %v1631_v40 = vrot.slane %v1511_v36, %v3952_v43  ;;  %v536_v28 = vld [vmem:[%s4783_s0 + $0x28] sm:$0xf]  ;;  %v3134_v36 = vld [vmem:[%s4783_s0 + $0xac] sm:$0xf] }
  0xd8   :  { %v3166_v41 = vcombine.low %v1854_v30, %v1855_v31  ;;  %v609_v46 = vpop.permute.xlu0 %608 }
  0xd9   :  { %v1838_v47 = vmul.bf16 %v3129_v34, %v1624_v39  ;;  %v1839_v48 = vmul.bf16 %v3130_v35, %v1631_v40  ;;  %v812_v49 = vrot.slane %v609_v46, %v3950_v42  ;;  %v819_v50 = vrot.slane %v609_v46, %v3952_v43  ;;  %v3133_v35 = vld [vmem:[%s4783_s0 + $0xa8] sm:$0xf]  ;;  %v554_v46 = vld [vmem:[%s4783_s0 + $0x70] sm:$0xf] }
  0xda   :  { %3265 = vmatprep.subr.bf16.mxu1 %v3166_v41  ;;  %v1547_v53 = vpop.permute.xlu1 %1546  ;;  %v3110_v54 = vcombine.low %v900_v37, %v901_v38 }
  0xdb   :  { %v918_v55 = vmul.bf16 %v812_v49, %v550_v44  ;;  %v919_v56 = vmul.bf16 %v819_v50, %v551_v45  ;;  %v1750_v57 = vrot.slane %v1547_v53, %v3950_v42  ;;  %v1757_v58 = vrot.slane %v1547_v53, %v3952_v43 }
  0xdc   :  { %3178 = vmatpush3.bf16.msra.mxu0 %v3110_v54  ;;  %v3158_v59 = vcombine.low %v1838_v47, %v1839_v48  ;;  %v577_v62 = vpop.permute.xlu0 %576  ;;  %v555_v47 = vld [vmem:[%s4783_s0 + $0x74] sm:$0xf] }
  0xdd   :  { %v1856_v63 = vmul.bf16 %v3147_v51, %v1750_v57  ;;  %v1857_v0 = vmul.bf16 %v3148_v52, %v1757_v58  ;;  %v700_v1 = vrot.slane %v577_v62, %v3950_v42  ;;  %v707_v2 = vrot.slane %v577_v62, %v3952_v43  ;;  %v3152_v57 = vld [vmem:[%s4783_s0 + $0xf4] sm:$0xf] }
  0xde   :  { %3266 = vmatpush3.bf16.msra.mxu1 %v3158_v59  ;;  %v3119_v3 = vcombine.low %v918_v55, %v919_v56  ;;  %v3151_v56 = vld [vmem:[%s4783_s0 + $0xf0] sm:$0xf] }
  0xdf   :  { %v902_v4 = vmul.bf16 %v700_v1, %v534_v60  ;;  %v903_v5 = vmul.bf16 %v707_v2, %v535_v61  ;;  %v3167_v6 = vcombine.low %v1856_v63, %v1857_v0  ;;  %v538_v2 = vld [vmem:[%s4783_s0 + $0x30] sm:$0xf] }
  0xe0   :  { %3179 = vmatprep.subr.bf16.mxu0 %v3119_v3  ;;  %v539_v3 = vld [vmem:[%s4783_s0 + $0x34] sm:$0xf] }
  0xe1   :  { %3267 = vmatprep.subr.bf16.mxu1 %v3167_v6  ;;  %v3111_v7 = vcombine.low %v902_v4, %v903_v5 }
  0xe3   :  { %3180 = vmatpush3.bf16.msra.mxu0 %v3111_v7  ;;  %v3135_v7 = vld [vmem:[%s4783_s0 + $0xb0] sm:$0xf] }
  0xea   :  { %v1515_v10 = vpop.permute.xlu1 %1514 }
  0xeb   :  { %v1638_v11 = vrot.slane %v1515_v10, %v3950_v42  ;;  %v1645_v12 = vrot.slane %v1515_v10, %v3952_v43 }
  0xed   :  { %v1840_v13 = vmul.bf16 %v3131_v8, %v1638_v11  ;;  %v1841_v14 = vmul.bf16 %v3132_v9, %v1645_v12  ;;  %v613_v17 = vpop.permute.xlu0 %612  ;;  %v3136_v8 = vld [vmem:[%s4783_s0 + $0xb4] sm:$0xf] }
  0xee   :  { %v826_v18 = vrot.slane %v613_v17, %v3950_v42  ;;  %v833_v19 = vrot.slane %v613_v17, %v3952_v43 }
  0xef   :  { %v1551_v22 = vpop.permute.xlu1 %1550  ;;  %v3159_v23 = vcombine.low %v1840_v13, %v1841_v14  ;;  %v556_v14 = vld [vmem:[%s4783_s0 + $0x78] sm:$0xf] }
  0xf0   :  { %v920_v24 = vmul.bf16 %v826_v18, %v552_v15  ;;  %v921_v25 = vmul.bf16 %v833_v19, %v553_v16  ;;  %v1764_v26 = vrot.slane %v1551_v22, %v3950_v42  ;;  %v1771_v27 = vrot.slane %v1551_v22, %v3952_v43  ;;  %v557_v15 = vld [vmem:[%s4783_s0 + $0x7c] sm:$0xf] }
  0xf1   :  { %3268 = vmatpush3.bf16.msra.mxu1 %v3159_v23  ;;  %v581_v30 = vpop.permute.xlu0 %580  ;;  %v3154_v22 = vld [vmem:[%s4783_s0 + $0xfc] sm:$0xf] }
  0xf2   :  { %v1858_v31 = vmul.bf16 %v3149_v20, %v1764_v26  ;;  %v1859_v32 = vmul.bf16 %v3150_v21, %v1771_v27  ;;  %v714_v33 = vrot.slane %v581_v30, %v3950_v42  ;;  %v721_v34 = vrot.slane %v581_v30, %v3952_v43  ;;  %v3153_v21 = vld [vmem:[%s4783_s0 + $0xf8] sm:$0xf] }
  0xf3   :  { %v1519_v37 = vpop.permute.xlu1 %1518  ;;  %v3120_v38 = vcombine.low %v920_v24, %v921_v25  ;;  %v540_v30 = vld [vmem:[%s4783_s0 + $0x38] sm:$0xf] }
  0xf4   :  { %v904_v39 = vmul.bf16 %v714_v33, %v536_v28  ;;  %v905_v40 = vmul.bf16 %v721_v34, %v537_v29  ;;  %v1652_v41 = vrot.slane %v1519_v37, %v3950_v42  ;;  %v1659_v44 = vrot.slane %v1519_v37, %v3952_v43  ;;  %v3137_v37 = vld [vmem:[%s4783_s0 + $0xb8] sm:$0xf] }
  0xf5   :  { %3181 = vmatprep.subr.bf16.mxu0 %v3120_v38  ;;  %v3168_v45 = vcombine.low %v1858_v31, %v1859_v32  ;;  %v617_v48 = vpop.permute.xlu0 %616  ;;  %v541_v31 = vld [vmem:[%s4783_s0 + $0x3c] sm:$0xf] }
  0xf6   :  { %v1842_v49 = vmul.bf16 %v3133_v35, %v1652_v41  ;;  %v1843_v50 = vmul.bf16 %v3134_v36, %v1659_v44  ;;  %v840_v51 = vrot.slane %v617_v48, %v3950_v42  ;;  %v847_v52 = vrot.slane %v617_v48, %v3952_v43  ;;  %v3138_v38 = vld [vmem:[%s4783_s0 + $0xbc] sm:$0xf] }
  0xf7   :  { %3269 = vmatprep.subr.bf16.mxu1 %v3168_v45  ;;  %v3112_v53 = vcombine.low %v904_v39, %v905_v40 }
  0xf8   :  { %v922_v54 = vmul.bf16 %v840_v51, %v554_v46  ;;  %v923_v55 = vmul.bf16 %v847_v52, %v555_v47  ;;  %v1555_v58 = vpop.permute.xlu1 %1554  ;;  %v3160_v59 = vcombine.low %v1842_v49, %v1843_v50  ;;  %v3355_v51 = vld [vmem:[%s4785_s2] ss:$8 sps:$4 sm:$0xff]  }
  0xf9   :  { %v1778_v60 = vrot.slane %v1555_v58, %v3950_v42  ;;  %v1785_v61 = vrot.slane %v1555_v58, %v3952_v43  ;;  %3182 = vmatpush3.bf16.msra.mxu0 %v3112_v53  ;;  %v3358_v53 = vld [vmem:[%s4785_s2 + $0x14] ss:$8 sps:$4 sm:$0xff]   ;;  %v3369_v58 = vld [vmem:[%s4785_s2 + $0x40] ss:$8 sps:$4 sm:$0xff]  }
  0xfa   :  { %3270 = vmatpush3.bf16.msra.mxu1 %v3160_v59  ;;  %v3121_v62 = vcombine.low %v922_v54, %v923_v55  ;;  %v3363_v54 = vld [vmem:[%s4785_s2 + $0x20] ss:$8 sps:$4 sm:$0xff]   ;;  %v3364_v55 = vld [vmem:[%s4785_s2 + $0x34] ss:$8 sps:$4 sm:$0xff]  }
  0xfb   :  { %v1860_v63 = vmul.bf16 %v3151_v56, %v1778_v60  ;;  %v1861_v0 = vmul.bf16 %v3152_v57, %v1785_v61  ;;  %v3366_v56 = vld [vmem:[%s4785_s2 + $0x30] ss:$8 sps:$4 sm:$0xff]   ;;  %v3367_v57 = vld [vmem:[%s4785_s2 + $0x44] ss:$8 sps:$4 sm:$0xff]   ;;  %v3370_v59 = vld [vmem:[%s4785_s2 + $0x54] ss:$8 sps:$4 sm:$0xff]  }
  0xfc   :  { %3183 = vmatprep.subr.bf16.mxu0 %v3121_v62  ;;  %v3372_v60 = vld [vmem:[%s4785_s2 + $0x50] ss:$8 sps:$4 sm:$0xff]   ;;  %v3373_v61 = vld [vmem:[%s4785_s2 + $0x64] ss:$8 sps:$4 sm:$0xff]   ;;  %v3375_v62 = vld [vmem:[%s4785_s2 + $0x60] ss:$8 sps:$4 sm:$0xff]  }
  0xfd   :  { %v3169_v1 = vcombine.low %v1860_v63, %v1861_v0  ;;  %v3376_v63 = vld [vmem:[%s4785_s2 + $0x74] ss:$8 sps:$4 sm:$0xff]   ;;  %v3378_v0 = vld [vmem:[%s4785_s2 + $0x70] ss:$8 sps:$4 sm:$0xff]  }
  0xff   :  { %3271 = vmatprep.subr.bf16.mxu1 %v3169_v1  ;;  %v3379_v1 = vld [vmem:[%s4785_s2 + $0x84] ss:$8 sps:$4 sm:$0xff]  }
 0x106   :  { %v585_v4 = vpop.permute.xlu0 %584 }
 0x107   :  { %v728_v5 = vrot.slane %v585_v4, %v3950_v42  ;;  %v735_v6 = vrot.slane %v585_v4, %v3952_v43  ;;  %v3384_v4 = vld [vmem:[%s4785_s2 + $0x90] ss:$8 sps:$4 sm:$0xff]  }
 0x108   :  { %v1523_v9 = vpop.permute.xlu1 %1522 }
 0x109   :  { %v906_v10 = vmul.bf16 %v728_v5, %v538_v2  ;;  %v907_v11 = vmul.bf16 %v735_v6, %v539_v3  ;;  %v1666_v12 = vrot.slane %v1523_v9, %v3950_v42  ;;  %v1673_v13 = vrot.slane %v1523_v9, %v3952_v43  ;;  %v3381_v2 = vld [vmem:[%s4785_s2 + $0x80] ss:$8 sps:$4 sm:$0xff]   ;;  %v3382_v3 = vld [vmem:[%s4785_s2 + $0x94] ss:$8 sps:$4 sm:$0xff]   ;;  %v3385_v5 = vld [vmem:[%s4785_s2 + $0xa4] ss:$8 sps:$4 sm:$0xff]  }
 0x10a   :  { %v621_v16 = vpop.permute.xlu0 %620  ;;  %v3387_v6 = vld [vmem:[%s4785_s2 + $0xa0] ss:$8 sps:$4 sm:$0xff]  }
 0x10b   :  { %v1844_v17 = vmul.bf16 %v3135_v7, %v1666_v12  ;;  %v1845_v18 = vmul.bf16 %v3136_v8, %v1673_v13  ;;  %v854_v19 = vrot.slane %v621_v16, %v3950_v42  ;;  %v861_v20 = vrot.slane %v621_v16, %v3952_v43  ;;  %v3388_v7 = vld [vmem:[%s4785_s2 + $0xb4] ss:$8 sps:$4 sm:$0xff]   ;;  %v3390_v8 = vld [vmem:[%s4785_s2 + $0xb0] ss:$8 sps:$4 sm:$0xff]  }
 0x10c   :  { %v1559_v23 = vpop.permute.xlu1 %1558  ;;  %v3113_v24 = vcombine.low %v906_v10, %v907_v11 }
 0x10d   :  { %v924_v25 = vmul.bf16 %v854_v19, %v556_v14  ;;  %v925_v26 = vmul.bf16 %v861_v20, %v557_v15  ;;  %v1792_v27 = vrot.slane %v1559_v23, %v3950_v42  ;;  %v1799_v28 = vrot.slane %v1559_v23, %v3952_v43 }
 0x10e   :  { %3184 = vmatpush3.bf16.msra.mxu0 %v3113_v24  ;;  %v3161_v29 = vcombine.low %v1844_v17, %v1845_v18  ;;  %v589_v32 = vpop.permute.xlu0 %588 }
 0x10f   :  { %v1862_v33 = vmul.bf16 %v3153_v21, %v1792_v27  ;;  %v1863_v34 = vmul.bf16 %v3154_v22, %v1799_v28  ;;  %v742_v35 = vrot.slane %v589_v32, %v3950_v42  ;;  %v749_v36 = vrot.slane %v589_v32, %v3952_v43 }
 0x110   :  { %3272 = vmatpush3.bf16.msra.mxu1 %v3161_v29  ;;  %v1527_v39 = vpop.permute.xlu1 %1526  ;;  %v3122_v40 = vcombine.low %v924_v25, %v925_v26 }
 0x111   :  { %v908_v41 = vmul.bf16 %v742_v35, %v540_v30  ;;  %v909_v44 = vmul.bf16 %v749_v36, %v541_v31  ;;  %v1680_v45 = vrot.slane %v1527_v39, %v3950_v42  ;;  %v1687_v46 = vrot.slane %v1527_v39, %v3952_v43  ;;  %v3360_v42 = vld [vmem:[%s4785_s2 + $0x10] ss:$8 sps:$4 sm:$0xff]   ;;  %v3361_v43 = vld [vmem:[%s4785_s2 + $0x24] ss:$8 sps:$4 sm:$0xff]  }
 0x112   :  { %3185 = vmatprep.subr.bf16.mxu0 %v3122_v40  ;;  %v3170_v47 = vcombine.low %v1862_v33, %v1863_v34 }
 0x113   :  { %v1846_v48 = vmul.bf16 %v3137_v37, %v1680_v45  ;;  %v1847_v49 = vmul.bf16 %v3138_v38, %v1687_v46  ;;  %v3114_v50 = vcombine.low %v908_v41, %v909_v44 }
 0x114   :  { %3273 = vmatprep.subr.bf16.mxu1 %v3170_v47 }
 0x115   :  { %3186 = vmatpush3.bf16.msra.mxu0 %v3114_v50  ;;  %v3162_v52 = vcombine.low %v1846_v48, %v1847_v49 }
 0x117   :  { %3274 = vmatpush3.bf16.msra.mxu1 %v3162_v52 }
 0x118   :  { %1175 = vmatmul.mubr.bf16.vlgmr.msra.gmra.mrb[0].mxu0 %v3355_v51 }
 0x119   :  { %1182 = vmatprep.mubr.bf16.mxu0 %v3358_v53 }
 0x11a   :  { %1993 = vmatmul.mubr.bf16.vlgmr.msra.gmra.mrb[0].mxu1 %v3355_v51 }
 0x11b   :  { %2000 = vmatprep.mubr.bf16.mxu1 %v3358_v53 }
 0x120   :  { %1183 = vmatmul.mubr.bf16.gmra.mrb[4].mxu0 %v3360_v42 }
 0x121   :  { %1190 = vmatprep.mubr.bf16.mxu0 %v3361_v43 }
 0x122   :  { %2001 = vmatmul.mubr.bf16.gmra.mrb[4].mxu1 %v3360_v42 }
 0x123   :  { %2008 = vmatprep.mubr.bf16.mxu1 %v3361_v43 }
 0x128   :  { %1191 = vmatmul.mubr.bf16.gmra.mrb[8].mxu0 %v3363_v54 }
 0x129   :  { %1198 = vmatprep.mubr.bf16.mxu0 %v3364_v55 }
 0x12a   :  { %2009 = vmatmul.mubr.bf16.gmra.mrb[8].mxu1 %v3363_v54 }
 0x12b   :  { %2016 = vmatprep.mubr.bf16.mxu1 %v3364_v55 }
 0x130   :  { %1199 = vmatmul.mubr.bf16.gmra.mrb[12].mxu0 %v3366_v56 }
 0x131   :  { %1206 = vmatprep.mubr.bf16.mxu0 %v3367_v57 }
 0x132   :  { %2017 = vmatmul.mubr.bf16.gmra.mrb[12].mxu1 %v3366_v56 }
 0x133   :  { %2024 = vmatprep.mubr.bf16.mxu1 %v3367_v57 }
 0x138   :  { %1207 = vmatmul.mubr.bf16.gmra.mrb[16].mxu0 %v3369_v58 }
 0x139   :  { %1214 = vmatprep.mubr.bf16.mxu0 %v3370_v59 }
 0x13a   :  { %2025 = vmatmul.mubr.bf16.gmra.mrb[16].mxu1 %v3369_v58 }
 0x13b   :  { %2032 = vmatprep.mubr.bf16.mxu1 %v3370_v59 }
 0x140   :  { %1215 = vmatmul.mubr.bf16.gmra.mrb[20].mxu0 %v3372_v60 }
 0x141   :  { %1222 = vmatprep.mubr.bf16.mxu0 %v3373_v61 }
 0x142   :  { %2033 = vmatmul.mubr.bf16.gmra.mrb[20].mxu1 %v3372_v60 }
 0x143   :  { %2040 = vmatprep.mubr.bf16.mxu1 %v3373_v61 }
 0x148   :  { %1223 = vmatmul.mubr.bf16.gmra.mrb[24].mxu0 %v3375_v62 }
 0x149   :  { %1230 = vmatprep.mubr.bf16.mxu0 %v3376_v63 }
 0x14a   :  { %2041 = vmatmul.mubr.bf16.gmra.mrb[24].mxu1 %v3375_v62 }
 0x14b   :  { %2048 = vmatprep.mubr.bf16.mxu1 %v3376_v63 }
 0x150   :  { %1231 = vmatmul.mubr.bf16.gmra.mrb[28].mxu0 %v3378_v0 }
 0x151   :  { %1238 = vmatprep.mubr.bf16.mxu0 %v3379_v1 }
 0x152   :  { %2049 = vmatmul.mubr.bf16.gmra.mrb[28].mxu1 %v3378_v0 }
 0x153   :  { %2056 = vmatprep.mubr.bf16.mxu1 %v3379_v1 }
 0x158   :  { %1239 = vmatmul.mubr.bf16.gmra.mrb[32].mxu0 %v3381_v2 }
 0x159   :  { %1246 = vmatprep.mubr.bf16.mxu0 %v3382_v3 }
 0x15a   :  { %2057 = vmatmul.mubr.bf16.gmra.mrb[32].mxu1 %v3381_v2 }
 0x15b   :  { %2064 = vmatprep.mubr.bf16.mxu1 %v3382_v3 }
 0x160   :  { %1247 = vmatmul.mubr.bf16.gmra.mrb[36].mxu0 %v3384_v4 }
 0x161   :  { %1254 = vmatprep.mubr.bf16.mxu0 %v3385_v5 }
 0x162   :  { %2065 = vmatmul.mubr.bf16.gmra.mrb[36].mxu1 %v3384_v4 }
 0x163   :  { %2072 = vmatprep.mubr.bf16.mxu1 %v3385_v5 }
 0x168   :  { %1255 = vmatmul.mubr.bf16.gmra.mrb[40].mxu0 %v3387_v6 }
 0x169   :  { %1262 = vmatprep.mubr.bf16.mxu0 %v3388_v7 }
 0x16a   :  { %2073 = vmatmul.mubr.bf16.gmra.mrb[40].mxu1 %v3387_v6 }
 0x16b   :  { %2080 = vmatprep.mubr.bf16.mxu1 %v3388_v7 }
 0x170   :  { %1263 = vmatmul.mubr.bf16.gmra.mrb[44].mxu0 %v3390_v8 }
 0x172   :  { %2081 = vmatmul.mubr.bf16.gmra.mrb[44].mxu1 %v3390_v8 }
 0x1eb   :  { %v3187_v9 = vpop.f32.mrb[0].mxu0 }
 0x1ec   :  { %v3188_v10 = vpop.f32.mrb[1].mxu0 }
 0x1ed   :  { %v3275_v11 = vpop.f32.mrb[0].mxu1  ;;  %v3189_v12 = vadd.f32 %v3188_v10, %v3187_v9  ;;  %v3190_v13 = vpop.f32.mrb[2].mxu0 }
 0x1ee   :  { %v3276_v14 = vpop.f32.mrb[1].mxu1  ;;  %v3191_v15 = vpop.f32.mrb[3].mxu0 }
 0x1ef   :  { %1271 = vst [vmem:[#allocation2] sm:$0xff] %v3189_v12  ;;  %v3277_v16 = vadd.f32 %v3276_v14, %v3275_v11  ;;  %v3278_v17 = vpop.f32.mrb[2].mxu1  ;;  %v3192_v18 = vadd.f32 %v3191_v15, %v3190_v13  ;;  %1295 = vadd.xlane.f32.xlu0 %v3189_v12  ;;  %v1367_v29 = vmul.f32 %v3189_v12, %v3189_v12 }
 0x1f0   :  { %v3279_v19 = vpop.f32.mrb[3].mxu1 }
 0x1f1   :  { %2090 = vst [vmem:[#allocation2 + $0xc0] sm:$0xff] %v3277_v16  ;;  %1272 = vst [vmem:[#allocation2 + $0x8] sm:$0xff] %v3192_v18  ;;  %v3280_v20 = vadd.f32 %v3279_v19, %v3278_v17  ;;  %2114 = vadd.xlane.f32.xlu1 %v3277_v16  ;;  %v1368_v23 = vmul.f32 %v3192_v18, %v3192_v18  ;;  %v2186_v36 = vmul.f32 %v3277_v16, %v3277_v16 }
 0x1f3   :  { %2091 = vst [vmem:[#allocation2 + $0xc8] sm:$0xff] %v3280_v20  ;;  %2116 = vadd.xlane.f32.xlu0 %v3280_v20  ;;  %v3193_v21 = vpop.f32.mrb[4].mxu0  ;;  %v2187_v34 = vmul.f32 %v3280_v20, %v3280_v20 }
 0x1f4   :  { %v3194_v22 = vpop.f32.mrb[5].mxu0 }
 0x1f5   :  { %1297 = vadd.xlane.f32.xlu1 %v3192_v18  ;;  %v3195_v24 = vadd.f32 %v3194_v22, %v3193_v21  ;;  %v3196_v25 = vpop.f32.mrb[6].mxu0  ;;  %v3281_v26 = vpop.f32.mrb[4].mxu1 }
 0x1f6   :  { %v3197_v27 = vpop.f32.mrb[7].mxu0  ;;  %v3282_v28 = vpop.f32.mrb[5].mxu1 }
 0x1f7   :  { %1393 = vadd.xlane.f32.xlu0 %v1368_v23  ;;  %1273 = vst [vmem:[#allocation2 + $0x10] sm:$0xff] %v3195_v24  ;;  %v3198_v30 = vadd.f32 %v3197_v27, %v3196_v25  ;;  %v3283_v31 = vadd.f32 %v3282_v28, %v3281_v26  ;;  %v3284_v32 = vpop.f32.mrb[6].mxu1  ;;  %v1369_v51 = vmul.f32 %v3195_v24, %v3195_v24 }
 0x1f8   :  { %v3285_v33 = vpop.f32.mrb[7].mxu1 }
 0x1f9   :  { %1391 = vadd.xlane.f32.xlu1 %v1367_v29  ;;  %1274 = vst [vmem:[#allocation2 + $0x18] sm:$0xff] %v3198_v30  ;;  %2092 = vst [vmem:[#allocation2 + $0xd0] sm:$0xff] %v3283_v31  ;;  %v3286_v35 = vadd.f32 %v3285_v33, %v3284_v32  ;;  %v2188_v42 = vmul.f32 %v3283_v31, %v3283_v31  ;;  %v1370_v62 = vmul.f32 %v3198_v30, %v3198_v30 }
 0x1fb   :  { %2212 = vadd.xlane.f32.xlu0 %v2187_v34  ;;  %2093 = vst [vmem:[#allocation2 + $0xd8] sm:$0xff] %v3286_v35  ;;  %v3199_v37 = vpop.f32.mrb[8].mxu0  ;;  %v2189_v2 = vmul.f32 %v3286_v35, %v3286_v35 }
 0x1fc   :  { %v3200_v38 = vpop.f32.mrb[9].mxu0 }
 0x1fd   :  { %2210 = vadd.xlane.f32.xlu1 %v2186_v36  ;;  %v3201_v39 = vadd.f32 %v3200_v38, %v3199_v37  ;;  %v3287_v40 = vpop.f32.mrb[8].mxu1  ;;  %v3202_v41 = vpop.f32.mrb[10].mxu0 }
 0x1fe   :  { %v3288_v44 = vpop.f32.mrb[9].mxu1  ;;  %v3203_v45 = vpop.f32.mrb[11].mxu0 }
 0x1ff   :  { %1299 = vadd.xlane.f32.xlu0 %v3195_v24  ;;  %1275 = vst [vmem:[#allocation2 + $0x20] sm:$0xff] %v3201_v39  ;;  %v3289_v46 = vadd.f32 %v3288_v44, %v3287_v40  ;;  %v4279_v47 = vadd.f32 %v3203_v45, %v3202_v41  ;;  %v3290_v48 = vpop.f32.mrb[10].mxu1  ;;  %v1371_v12 = vmul.f32 %v3201_v39, %v3201_v39 }
 0x200   :  { %v3291_v49 = vpop.f32.mrb[11].mxu1 }
 0x201   :  { %2118 = vadd.xlane.f32.xlu1 %v3283_v31  ;;  %2094 = vst [vmem:[#allocation2 + $0xe0] sm:$0xff] %v3289_v46  ;;  %1276 = vst [vmem:[#allocation2 + $0x28] sm:$0xff] %v4279_v47  ;;  %v4282_v50 = vadd.f32 %v3291_v49, %v3290_v48  ;;  %v2190_v16 = vmul.f32 %v3289_v46, %v3289_v46  ;;  %v1372_v26 = vmul.f32 %v4279_v47, %v4279_v47 }
 0x203   :  { %1301 = vadd.xlane.f32.xlu0 %v3198_v30  ;;  %2095 = vst [vmem:[#allocation2 + $0xe8] sm:$0xff] %v4282_v50  ;;  %v3205_v52 = vpop.f32.mrb[12].mxu0  ;;  %v2191_v30 = vmul.f32 %v4282_v50, %v4282_v50 }
 0x204   :  { %v3206_v53 = vpop.f32.mrb[13].mxu0 }
 0x205   :  { %1395 = vadd.xlane.f32.xlu1 %v1369_v51  ;;  %v4285_v43 = vadd.f32 %v3206_v53, %v3205_v52  ;;  %v3293_v54 = vpop.f32.mrb[12].mxu1  ;;  %v3208_v55 = vpop.f32.mrb[14].mxu0 }
 0x206   :  { %v3294_v56 = vpop.f32.mrb[13].mxu1  ;;  %v3209_v57 = vpop.f32.mrb[15].mxu0 }
 0x207   :  { %2120 = vadd.xlane.f32.xlu0 %v3286_v35  ;;  %1277 = vst [vmem:[#allocation2 + $0x30] sm:$0xff] %v4285_v43  ;;  %v4288_v58 = vadd.f32 %v3294_v56, %v3293_v54  ;;  %v4290_v59 = vadd.f32 %v3209_v57, %v3208_v55  ;;  %v3296_v60 = vpop.f32.mrb[14].mxu1  ;;  %v1373_v40 = vmul.f32 %v4285_v43, %v4285_v43 }
 0x208   :  { %v3297_v61 = vpop.f32.mrb[15].mxu1 }
 0x209   :  { %2214 = vadd.xlane.f32.xlu1 %v2188_v42  ;;  %2096 = vst [vmem:[#allocation2 + $0xf0] sm:$0xff] %v4288_v58  ;;  %1278 = vst [vmem:[#allocation2 + $0x38] sm:$0xff] %v4290_v59  ;;  %v4294_v63 = vadd.f32 %v3297_v61, %v3296_v60  ;;  %v1374_v54 = vmul.f32 %v4290_v59, %v4290_v59 }
 0x20b   :  { %1397 = vadd.xlane.f32.xlu0 %v1370_v62  ;;  %2097 = vst [vmem:[#allocation2 + $0xf8] sm:$0xff] %v4294_v63  ;;  %v3211_v0 = vpop.f32.mrb[16].mxu0 }
 0x20c   :  { %v3212_v1 = vpop.f32.mrb[17].mxu0 }
 0x20d   :  { %1303 = vadd.xlane.f32.xlu1 %v3201_v39  ;;  %v4297_v3 = vadd.f32 %v3212_v1, %v3211_v0  ;;  %v3299_v4 = vpop.f32.mrb[16].mxu1  ;;  %v3214_v5 = vpop.f32.mrb[18].mxu0 }
 0x20e   :  { %v3300_v6 = vpop.f32.mrb[17].mxu1  ;;  %v3215_v7 = vpop.f32.mrb[19].mxu0 }
 0x20f   :  { %2216 = vadd.xlane.f32.xlu0 %v2189_v2  ;;  %1279 = vst [vmem:[#allocation2 + $0x40] sm:$0xff] %v4297_v3  ;;  %v4300_v8 = vadd.f32 %v3300_v6, %v3299_v4  ;;  %v4302_v9 = vadd.f32 %v3215_v7, %v3214_v5  ;;  %v3302_v10 = vpop.f32.mrb[18].mxu1 }
 0x210   :  { %v3303_v11 = vpop.f32.mrb[19].mxu1 }
 0x211   :  { %2122 = vadd.xlane.f32.xlu1 %v3289_v46  ;;  %2098 = vst [vmem:[#allocation2 + $0x100] sm:$0xff] %v4300_v8  ;;  %1280 = vst [vmem:[#allocation2 + $0x48] sm:$0xff] %v4302_v9  ;;  %v4306_v13 = vadd.f32 %v3303_v11, %v3302_v10  ;;  %v2192_v46 = vmul.f32 %v4288_v58, %v4288_v58  ;;  %v2194_v11 = vmul.f32 %v4300_v8, %v4300_v8 }
 0x213   :  { %1305 = vadd.xlane.f32.xlu0 %v4279_v47  ;;  %2099 = vst [vmem:[#allocation2 + $0x108] sm:$0xff] %v4306_v13  ;;  %v3217_v14 = vpop.f32.mrb[20].mxu0 }
 0x214   :  { %v3218_v15 = vpop.f32.mrb[21].mxu0 }
 0x215   :  { %1399 = vadd.xlane.f32.xlu1 %v1371_v12  ;;  %v4310_v17 = vadd.f32 %v3218_v15, %v3217_v14  ;;  %v3305_v18 = vpop.f32.mrb[20].mxu1  ;;  %v3220_v19 = vpop.f32.mrb[22].mxu0 }
 0x216   :  { %v3306_v20 = vpop.f32.mrb[21].mxu1  ;;  %v3221_v21 = vpop.f32.mrb[23].mxu0 }
 0x217   :  { %2124 = vadd.xlane.f32.xlu0 %v4282_v50  ;;  %1281 = vst [vmem:[#allocation2 + $0x50] sm:$0xff] %v4310_v17  ;;  %v4314_v22 = vadd.f32 %v3306_v20, %v3305_v18  ;;  %v4316_v23 = vadd.f32 %v3221_v21, %v3220_v19  ;;  %v3308_v24 = vpop.f32.mrb[22].mxu1 }
 0x218   :  { %v3309_v25 = vpop.f32.mrb[23].mxu1 }
 0x219   :  { %2218 = vadd.xlane.f32.xlu1 %v2190_v16  ;;  %2100 = vst [vmem:[#allocation2 + $0x110] sm:$0xff] %v4314_v22  ;;  %1282 = vst [vmem:[#allocation2 + $0x58] sm:$0xff] %v4316_v23  ;;  %v4322_v27 = vadd.f32 %v3309_v25, %v3308_v24 }
 0x21b   :  { %1401 = vadd.xlane.f32.xlu0 %v1372_v26  ;;  %2101 = vst [vmem:[#allocation2 + $0x118] sm:$0xff] %v4322_v27  ;;  %v3223_v28 = vpop.f32.mrb[24].mxu0 }
 0x21c   :  { %v3224_v29 = vpop.f32.mrb[25].mxu0 }
 0x21d   :  { %1307 = vadd.xlane.f32.xlu1 %v4285_v43  ;;  %v4328_v31 = vadd.f32 %v3224_v29, %v3223_v28  ;;  %v3311_v32 = vpop.f32.mrb[24].mxu1  ;;  %v3226_v33 = vpop.f32.mrb[26].mxu0  ;;  %v2195_v28 = vmul.f32 %v4306_v13, %v4306_v13 }
 0x21e   :  { %v3312_v34 = vpop.f32.mrb[25].mxu1  ;;  %v3227_v35 = vpop.f32.mrb[27].mxu0 }
 0x21f   :  { %2220 = vadd.xlane.f32.xlu0 %v2191_v30  ;;  %1283 = vst [vmem:[#allocation2 + $0x60] sm:$0xff] %v4328_v31  ;;  %v4331_v36 = vadd.f32 %v3312_v34, %v3311_v32  ;;  %v4333_v37 = vadd.f32 %v3227_v35, %v3226_v33  ;;  %v3314_v38 = vpop.f32.mrb[26].mxu1 }
 0x220   :  { %v3315_v39 = vpop.f32.mrb[27].mxu1 }
 0x221   :  { %2126 = vadd.xlane.f32.xlu1 %v4288_v58  ;;  %2102 = vst [vmem:[#allocation2 + $0x120] sm:$0xff] %v4331_v36  ;;  %1284 = vst [vmem:[#allocation2 + $0x68] sm:$0xff] %v4333_v37  ;;  %v4340_v41 = vadd.f32 %v3315_v39, %v3314_v38  ;;  %v2193_v58 = vmul.f32 %v4294_v63, %v4294_v63 }
 0x223   :  { %1309 = vadd.xlane.f32.xlu0 %v4290_v59  ;;  %2103 = vst [vmem:[#allocation2 + $0x128] sm:$0xff] %v4340_v41  ;;  %v3229_v44 = vpop.f32.mrb[28].mxu0 }
 0x224   :  { %v3230_v45 = vpop.f32.mrb[29].mxu0 }
 0x225   :  { %1403 = vadd.xlane.f32.xlu1 %v1373_v40  ;;  %v4346_v47 = vadd.f32 %v3230_v45, %v3229_v44  ;;  %v3317_v48 = vpop.f32.mrb[28].mxu1  ;;  %v3232_v49 = vpop.f32.mrb[30].mxu0 }
 0x226   :  { %v3318_v50 = vpop.f32.mrb[29].mxu1  ;;  %v3233_v51 = vpop.f32.mrb[31].mxu0 }
 0x227   :  { %2128 = vadd.xlane.f32.xlu0 %v4294_v63  ;;  %1285 = vst [vmem:[#allocation2 + $0x70] sm:$0xff] %v4346_v47  ;;  %v4350_v52 = vadd.f32 %v3318_v50, %v3317_v48  ;;  %v4352_v53 = vadd.f32 %v3233_v51, %v3232_v49  ;;  %v3320_v42 = vpop.f32.mrb[30].mxu1  ;;  %v1375_v63 = vmul.f32 %v4297_v3, %v4297_v3 }
 0x228   :  { %v3321_v43 = vpop.f32.mrb[31].mxu1 }
 0x229   :  { %2222 = vadd.xlane.f32.xlu1 %v2192_v46  ;;  %2104 = vst [vmem:[#allocation2 + $0x130] sm:$0xff] %v4350_v52  ;;  %1286 = vst [vmem:[#allocation2 + $0x78] sm:$0xff] %v4352_v53  ;;  %v4358_v55 = vadd.f32 %v3321_v43, %v3320_v42  ;;  %v2196_v46 = vmul.f32 %v4314_v22, %v4314_v22 }
 0x22b   :  { %1405 = vadd.xlane.f32.xlu0 %v1374_v54  ;;  %2105 = vst [vmem:[#allocation2 + $0x138] sm:$0xff] %v4358_v55  ;;  %v3235_v56 = vpop.f32.mrb[32].mxu0 }
 0x22c   :  { %v3236_v57 = vpop.f32.mrb[33].mxu0 }
 0x22d   :  { %1311 = vadd.xlane.f32.xlu1 %v4297_v3  ;;  %v4364_v60 = vadd.f32 %v3236_v57, %v3235_v56  ;;  %v3323_v61 = vpop.f32.mrb[32].mxu1  ;;  %v3238_v59 = vpop.f32.mrb[34].mxu0 }
 0x22e   :  { %v3324_v62 = vpop.f32.mrb[33].mxu1  ;;  %v3239_v0 = vpop.f32.mrb[35].mxu0 }
 0x22f   :  { %2224 = vadd.xlane.f32.xlu0 %v2193_v58  ;;  %1287 = vst [vmem:[#allocation2 + $0x80] sm:$0xff] %v4364_v60  ;;  %v4367_v1 = vadd.f32 %v3324_v62, %v3323_v61  ;;  %v4369_v2 = vadd.f32 %v3239_v0, %v3238_v59  ;;  %v3326_v4 = vpop.f32.mrb[34].mxu1  ;;  %v2197_v58 = vmul.f32 %v4322_v27, %v4322_v27 }
 0x230   :  { %v3327_v5 = vpop.f32.mrb[35].mxu1  ;;  %v2198_v61 = vmul.f32 %v4331_v36, %v4331_v36  ;;  %v1380_v59 = vmul.f32 %v4333_v37, %v4333_v37 }
 0x231   :  { %2130 = vadd.xlane.f32.xlu1 %v4300_v8  ;;  %2106 = vst [vmem:[#allocation2 + $0x140] sm:$0xff] %v4367_v1  ;;  %1288 = vst [vmem:[#allocation2 + $0x88] sm:$0xff] %v4369_v2  ;;  %v4376_v6 = vadd.f32 %v3327_v5, %v3326_v4  ;;  %v1376_v8 = vmul.f32 %v4302_v9, %v4302_v9 }
 0x233   :  { %1313 = vadd.xlane.f32.xlu0 %v4302_v9  ;;  %2107 = vst [vmem:[#allocation2 + $0x148] sm:$0xff] %v4376_v6  ;;  %v3241_v7 = vpop.f32.mrb[36].mxu0  ;;  %v2203_v62 = vmul.f32 %v4376_v6, %v4376_v6 }
 0x234   :  { %v3242_v10 = vpop.f32.mrb[37].mxu0 }
 0x235   :  { %1407 = vadd.xlane.f32.xlu1 %v1375_v63  ;;  %v4382_v12 = vadd.f32 %v3242_v10, %v3241_v7  ;;  %v3329_v14 = vpop.f32.mrb[36].mxu1  ;;  %v3244_v3 = vpop.f32.mrb[38].mxu0 }
 0x236   :  { %v3330_v15 = vpop.f32.mrb[37].mxu1  ;;  %v3245_v16 = vpop.f32.mrb[39].mxu0 }
 0x237   :  { %2132 = vadd.xlane.f32.xlu0 %v4306_v13  ;;  %1289 = vst [vmem:[#allocation2 + $0x90] sm:$0xff] %v4382_v12  ;;  %v4386_v18 = vadd.f32 %v3330_v15, %v3329_v14  ;;  %v4388_v19 = vadd.f32 %v3245_v16, %v3244_v3  ;;  %v3332_v20 = vpop.f32.mrb[38].mxu1  ;;  %v1377_v13 = vmul.f32 %v4310_v17, %v4310_v17 }
 0x238   :  { %v3333_v21 = vpop.f32.mrb[39].mxu1 }
 0x239   :  { %2226 = vadd.xlane.f32.xlu1 %v2194_v11  ;;  %2108 = vst [vmem:[#allocation2 + $0x150] sm:$0xff] %v4386_v18  ;;  %1290 = vst [vmem:[#allocation2 + $0x98] sm:$0xff] %v4388_v19  ;;  %v4394_v24 = vadd.f32 %v3333_v21, %v3332_v20  ;;  %v1386_v7 = vmul.f32 %v4388_v19, %v4388_v19 }
 0x23b   :  { %1409 = vadd.xlane.f32.xlu0 %v1376_v8  ;;  %2109 = vst [vmem:[#allocation2 + $0x158] sm:$0xff] %v4394_v24  ;;  %v3247_v25 = vpop.f32.mrb[40].mxu0 }
 0x23c   :  { %v3248_v26 = vpop.f32.mrb[41].mxu0 }
 0x23d   :  { %1315 = vadd.xlane.f32.xlu1 %v4310_v17  ;;  %v4400_v29 = vadd.f32 %v3248_v26, %v3247_v25  ;;  %v3335_v30 = vpop.f32.mrb[40].mxu1  ;;  %v3250_v9 = vpop.f32.mrb[42].mxu0 }
 0x23e   :  { %v3336_v32 = vpop.f32.mrb[41].mxu1  ;;  %v3251_v33 = vpop.f32.mrb[43].mxu0 }
 0x23f   :  { %2228 = vadd.xlane.f32.xlu0 %v2195_v28  ;;  %1291 = vst [vmem:[#allocation2 + $0xa0] sm:$0xff] %v4400_v29  ;;  %v4403_v34 = vadd.f32 %v3336_v32, %v3335_v30  ;;  %v4405_v35 = vadd.f32 %v3251_v33, %v3250_v9  ;;  %v3338_v38 = vpop.f32.mrb[42].mxu1  ;;  %v1387_v16 = vmul.f32 %v4400_v29, %v4400_v29 }
 0x240   :  { %v3339_v39 = vpop.f32.mrb[43].mxu1 }
 0x241   :  { %2134 = vadd.xlane.f32.xlu1 %v4314_v22  ;;  %2110 = vst [vmem:[#allocation2 + $0x160] sm:$0xff] %v4403_v34  ;;  %1292 = vst [vmem:[#allocation2 + $0xa8] sm:$0xff] %v4405_v35  ;;  %v4412_v40 = vadd.f32 %v3339_v39, %v3338_v38  ;;  %v1378_v22 = vmul.f32 %v4316_v23, %v4316_v23  ;;  %v1388_v32 = vmul.f32 %v4405_v35, %v4405_v35 }
 0x243   :  { %1317 = vadd.xlane.f32.xlu0 %v4316_v23  ;;  %2111 = vst [vmem:[#allocation2 + $0x168] sm:$0xff] %v4412_v40  ;;  %v3253_v44 = vpop.f32.mrb[44].mxu0  ;;  %v1379_v23 = vmul.f32 %v4328_v31, %v4328_v31 }
 0x244   :  { %v3254_v45 = vpop.f32.mrb[45].mxu0 }
 0x245   :  { %1411 = vadd.xlane.f32.xlu1 %v1377_v13  ;;  %v4418_v48 = vadd.f32 %v3254_v45, %v3253_v44  ;;  %v3341_v49 = vpop.f32.mrb[44].mxu1  ;;  %v3256_v17 = vpop.f32.mrb[46].mxu0 }
 0x246   :  { %v3342_v50 = vpop.f32.mrb[45].mxu1  ;;  %v3257_v51 = vpop.f32.mrb[47].mxu0 }
 0x247   :  { %2136 = vadd.xlane.f32.xlu0 %v4322_v27  ;;  %1293 = vst [vmem:[#allocation2 + $0xb0] sm:$0xff] %v4418_v48  ;;  %v4422_v42 = vadd.f32 %v3342_v50, %v3341_v49  ;;  %v4424_v43 = vadd.f32 %v3257_v51, %v3256_v17  ;;  %v3344_v54 = vpop.f32.mrb[46].mxu1  ;;  %v2199_v27 = vmul.f32 %v4340_v41, %v4340_v41 }
 0x248   :  { %v3345_v56 = vpop.f32.mrb[47].mxu1 }
 0x249   :  { %2230 = vadd.xlane.f32.xlu1 %v2196_v46  ;;  %2112 = vst [vmem:[#allocation2 + $0x170] sm:$0xff] %v4422_v42  ;;  %1294 = vst [vmem:[#allocation2 + $0xb8] sm:$0xff] %v4424_v43  ;;  %v4430_v57 = vadd.f32 %v3345_v56, %v3344_v54  ;;  %v2207_v46 = vmul.f32 %v4412_v40, %v4412_v40 }
 0x24b   :  { %1413 = vadd.xlane.f32.xlu0 %v1378_v22  ;;  %2113 = vst [vmem:[#allocation2 + $0x178] sm:$0xff] %v4430_v57 }
 0x24d   :  { %1319 = vadd.xlane.f32.xlu1 %v4328_v31  ;;  %v1381_v31 = vmul.f32 %v4346_v47, %v4346_v47 }
 0x24f   :  { %2232 = vadd.xlane.f32.xlu0 %v2197_v58  ;;  %v1389_v58 = vmul.f32 %v4418_v48, %v4418_v48 }
 0x251   :  { %2138 = vadd.xlane.f32.xlu1 %v4331_v36  ;;  %v2200_v36 = vmul.f32 %v4350_v52, %v4350_v52 }
 0x253   :  { %1321 = vadd.xlane.f32.xlu0 %v4333_v37  ;;  %v1382_v37 = vmul.f32 %v4352_v53, %v4352_v53 }
 0x255   :  { %1415 = vadd.xlane.f32.xlu1 %v1379_v23 }
 0x257   :  { %2140 = vadd.xlane.f32.xlu0 %v4340_v41  ;;  %v2201_v41 = vmul.f32 %v4358_v55, %v4358_v55 }
 0x259   :  { %2234 = vadd.xlane.f32.xlu1 %v2198_v61 }
 0x25b   :  { %1417 = vadd.xlane.f32.xlu0 %v1380_v59 }
 0x25d   :  { %1323 = vadd.xlane.f32.xlu1 %v4346_v47  ;;  %v1383_v47 = vmul.f32 %v4364_v60, %v4364_v60 }
 0x25f   :  { %2236 = vadd.xlane.f32.xlu0 %v2199_v27 }
 0x261   :  { %2142 = vadd.xlane.f32.xlu1 %v4350_v52  ;;  %v2202_v52 = vmul.f32 %v4367_v1, %v4367_v1 }
 0x263   :  { %1325 = vadd.xlane.f32.xlu0 %v4352_v53  ;;  %v1384_v53 = vmul.f32 %v4369_v2, %v4369_v2 }
 0x265   :  { %1419 = vadd.xlane.f32.xlu1 %v1381_v31 }
 0x267   :  { %2144 = vadd.xlane.f32.xlu0 %v4358_v55 }
 0x269   :  { %2238 = vadd.xlane.f32.xlu1 %v2200_v36 }
 0x26b   :  { %1421 = vadd.xlane.f32.xlu0 %v1382_v37 }
 0x26d   :  { %1327 = vadd.xlane.f32.xlu1 %v4364_v60 }
 0x26f   :  { %2240 = vadd.xlane.f32.xlu0 %v2201_v41  ;;  %v2208_v41 = vmul.f32 %v4422_v42, %v4422_v42 }
 0x271   :  { %2146 = vadd.xlane.f32.xlu1 %v4367_v1  ;;  %v1385_v1 = vmul.f32 %v4382_v12, %v4382_v12 }
 0x273   :  { %1329 = vadd.xlane.f32.xlu0 %v4369_v2  ;;  %v2204_v2 = vmul.f32 %v4386_v18, %v4386_v18 }
 0x275   :  { %1423 = vadd.xlane.f32.xlu1 %v1383_v47 }
 0x277   :  { %2148 = vadd.xlane.f32.xlu0 %v4376_v6 }
 0x279   :  { %2242 = vadd.xlane.f32.xlu1 %v2202_v52 }
 0x27b   :  { %1425 = vadd.xlane.f32.xlu0 %v1384_v53 }
 0x27c   :  { %v1296_v55 = vpop.xlane.xlu0 %1295 }
 0x27d   :  { %1331 = vadd.xlane.f32.xlu1 %v4382_v12  ;;  %v2205_v12 = vmul.f32 %v4394_v24, %v4394_v24 }
 0x27e   :  { %v2115_v60 = vpop.xlane.xlu1 %2114 }
 0x27f   :  { %2244 = vadd.xlane.f32.xlu0 %v2203_v62  ;;  %v2162_v21 = vadd.f32 %v2115_v60, %v1296_v55 }
 0x280   :  { %v2117_v0 = vpop.xlane.xlu0 %2116 }
 0x281   :  { %2150 = vadd.xlane.f32.xlu1 %v4386_v18  ;;  %v4493_v9 = vmul.f32 0.010204081, %v2162_v21 }
 0x282   :  { %v1298_v4 = vpop.xlane.xlu1 %1297 }
 0x283   :  { %1333 = vadd.xlane.f32.xlu0 %v4388_v19  ;;  %v2163_v15 = vadd.f32 %v2117_v0, %v1298_v4  ;;  %v2331_v44 = vmul.f32 %v4493_v9, %v4493_v9  ;;  %v1390_v0 = vmul.f32 %v4424_v43, %v4424_v43 }
 0x284   :  { %v1394_v5 = vpop.xlane.xlu0 %1393 }
 0x285   :  { %1427 = vadd.xlane.f32.xlu1 %v1385_v1  ;;  %v4488_v8 = vmul.f32 0.010204081, %v2163_v15 }
 0x286   :  { %v1392_v63 = vpop.xlane.xlu1 %1391 }
 0x287   :  { %2152 = vadd.xlane.f32.xlu0 %v4394_v24  ;;  %v2206_v24 = vmul.f32 %v4403_v34, %v4403_v34 }
 0x288   :  { %v2213_v6 = vpop.xlane.xlu0 %2212 }
 0x289   :  { %2246 = vadd.xlane.f32.xlu1 %v2204_v2  ;;  %v2259_v20 = vadd.f32 %v2213_v6, %v1394_v5 }
 0x28a   :  { %v2211_v10 = vpop.xlane.xlu1 %2210 }
 0x28b   :  { %1429 = vadd.xlane.f32.xlu0 %v1386_v7  ;;  %v2308_v26 = vmul.f32 0.010204081, %v2259_v20  ;;  %v2258_v28 = vadd.f32 %v2211_v10, %v1392_v63  ;;  %v2209_v10 = vmul.f32 %v4430_v57, %v4430_v57 }
 0x28c   :  { %v1300_v11 = vpop.xlane.xlu0 %1299 }
 0x28d   :  { %1335 = vadd.xlane.f32.xlu1 %v4400_v29  ;;  %v2332_v29 = vmul.f32 %v4488_v8, %v4488_v8  ;;  %v2307_v39 = vmul.f32 0.010204081, %v2258_v28 }
 0x28e   :  { %v2119_v14 = vpop.xlane.xlu1 %2118 }
 0x28f   :  { %2248 = vadd.xlane.f32.xlu0 %v2205_v12  ;;  %v2356_v38 = vsub.f32 %v2308_v26, %v2332_v29  ;;  %v2355_v51 = vsub.f32 %v2307_v39, %v2331_v44 }
 0x290   :  { %v1302_v3 = vpop.xlane.xlu0 %1301 }
 0x291   :  { %2154 = vadd.xlane.f32.xlu1 %v4403_v34  ;;  %v2164_v34 = vadd.f32 %v2119_v14, %v1300_v11  ;;  %v2380_v50 = vmax.f32 %v2356_v38, 0.0 }
 0x292   :  { %v1396_v18 = vpop.xlane.xlu1 %1395 }
 0x293   :  { %1337 = vadd.xlane.f32.xlu0 %v4405_v35  ;;  %v4504_v54 = vmul.f32 0.010204081, %v2164_v34  ;;  %v2404_v59 = vadd.f32 0.001, %v2380_v50 }
 0x294   :  { %v2121_v19 = vpop.xlane.xlu0 %2120 }
 0x295   :  { %1431 = vadd.xlane.f32.xlu1 %v1387_v16  ;;  %v2165_v45 = vadd.f32 %v2121_v19, %v1302_v3  ;;  %v2333_v31 = vmul.f32 %v4504_v54, %v4504_v54  ;;  %3647 = vrsqrt.f32 %v2404_v59 }
 0x296   :  { %v2215_v25 = vpop.xlane.xlu1 %2214 }
 0x297   :  { %2156 = vadd.xlane.f32.xlu0 %v4412_v40  ;;  %v2260_v49 = vadd.f32 %v2215_v25, %v1396_v18  ;;  %v4506_v22 = vmul.f32 0.010204081, %v2165_v45  ;;  %v2379_v40 = vmax.f32 %v2355_v51, 0.0  ;;  %v2500_v51 = vld [vmem:[%s4787_s4 + $0x8] sm:$0xff] }
 0x298   :  { %v1398_v30 = vpop.xlane.xlu0 %1397 }
 0x299   :  { %2250 = vadd.xlane.f32.xlu1 %v2206_v24  ;;  %v2309_v23 = vmul.f32 0.010204081, %v2260_v49  ;;  %v2334_v37 = vmul.f32 %v4506_v22, %v4506_v22  ;;  %v2403_v52 = vadd.f32 0.001, %v2379_v40 }
 0x29a   :  { %v1304_v33 = vpop.xlane.xlu1 %1303 }
 0x29b   :  { %1433 = vadd.xlane.f32.xlu0 %v1388_v32  ;;  %v2357_v47 = vsub.f32 %v2309_v23, %v2333_v31  ;;  %3649 = vrsqrt.f32 %v2403_v52  ;;  %v2453_v31 = vld [vmem:[%s4786_s3 + $0x10] sm:$0xff] }
 0x29c   :  { %v2217_v13 = vpop.xlane.xlu0 %2216 }
 0x29d   :  { %1339 = vadd.xlane.f32.xlu1 %v4418_v48  ;;  %v2261_v35 = vadd.f32 %v2217_v13, %v1398_v30  ;;  %v2381_v1 = vmax.f32 %v2357_v47, 0.0 }
 0x29e   :  { %v2123_v17 = vpop.xlane.xlu1 %2122 }
 0x29f   :  { %2252 = vadd.xlane.f32.xlu0 %v2207_v46  ;;  %v2310_v27 = vmul.f32 0.010204081, %v2261_v35  ;;  %v2166_v62 = vadd.f32 %v2123_v17, %v1304_v33  ;;  %v2405_v11 = vadd.f32 0.001, %v2381_v1  ;;  %v3648_v20 = vpop.eup %3647  ;;  %v2451_v33 = vld [vmem:[%s4786_s3] sm:$0xff] }
 0x2a0   :  { %v1306_v56 = vpop.xlane.xlu0 %1305 }
 0x2a1   :  { %2158 = vadd.xlane.f32.xlu1 %v4422_v42  ;;  %v2358_v53 = vsub.f32 %v2310_v27, %v2334_v37  ;;  %v4523_v63 = vmul.f32 0.010204081, %v2166_v62  ;;  %3651 = vrsqrt.f32 %v2405_v11 }
 0x2a2   :  { %v1400_v61 = vpop.xlane.xlu1 %1399 }
 0x2a3   :  { %1341 = vadd.xlane.f32.xlu0 %v4424_v43  ;;  %v2382_v2 = vmax.f32 %v2358_v53, 0.0  ;;  %v2335_v16 = vmul.f32 %v4523_v63, %v4523_v63 }
 0x2a4   :  { %v2125_v36 = vpop.xlane.xlu0 %2124 }
 0x2a5   :  { %1435 = vadd.xlane.f32.xlu1 %v1389_v58  ;;  %v2167_v55 = vadd.f32 %v2125_v36, %v1306_v56  ;;  %v2406_v3 = vadd.f32 0.001, %v2382_v2  ;;  %v3650_v29 = vpop.eup %3649  ;;  %v2454_v36 = vld [vmem:[%s4786_s3 + $0x18] sm:$0xff]  ;;  %v2499_v2 = vld [vmem:[%s4787_s4] sm:$0xff] }
 0x2a6   :  { %v2219_v48 = vpop.xlane.xlu1 %2218  ;;  %v2475_v46 = vmul.f32 %v3650_v29, %v2451_v33 }
 0x2a7   :  { %2160 = vadd.xlane.f32.xlu0 %v4430_v57  ;;  %v2262_v4 = vadd.f32 %v2219_v48, %v1400_v61  ;;  %v4521_v42 = vmul.f32 0.010204081, %v2167_v55  ;;  %v2452_v57 = vld [vmem:[%s4786_s3 + $0x8] sm:$0xff]  ;;  %3653 = vrsqrt.f32 %v2406_v3 }
 0x2a8   :  { %v1402_v60 = vpop.xlane.xlu0 %1401  ;;  %v2476_v30 = vmul.f32 %v3648_v20, %v2452_v57  ;;  %v2501_v57 = vld [vmem:[%s4787_s4 + $0x10] sm:$0xff] }
 0x2a9   :  { %2254 = vadd.xlane.f32.xlu1 %v2208_v41  ;;  %v2311_v12 = vmul.f32 0.010204081, %v2262_v4  ;;  %v2336_v43 = vmul.f32 %v4521_v42, %v4521_v42  ;;  %v2523_v4 = vmul.f32 %v2475_v46, %v4493_v9  ;;  %v2456_v9 = vld [vmem:[%s4786_s3 + $0x28] sm:$0xff] }
 0x2aa   :  { %v1308_v5 = vpop.xlane.xlu1 %1307  ;;  %v2524_v49 = vmul.f32 %v2476_v30, %v4488_v8 }
 0x2ab   :  { %1437 = vadd.xlane.f32.xlu0 %v1390_v0  ;;  %v2359_v24 = vsub.f32 %v2311_v12, %v2335_v16  ;;  %v3652_v61 = vpop.eup %3651 }
 0x2ac   :  { %v2221_v6 = vpop.xlane.xlu0 %2220  ;;  %v2548_v40 = vsub.f32 %v2500_v51, %v2524_v49  ;;  %v2477_v53 = vmul.f32 %v3652_v61, %v2453_v31  ;;  %v2457_v61 = vld [vmem:[%s4786_s3 + $0x30] sm:$0xff] }
 0x2ad   :  { %v2263_v7 = vadd.f32 %v2221_v6, %v1402_v60  ;;  %v2383_v38 = vmax.f32 %v2359_v24, 0.0  ;;  %v2455_v24 = vld [vmem:[%s4786_s3 + $0x20] sm:$0xff] }
 0x2ae   :  { %v2127_v14 = vpop.xlane.xlu1 %2126  ;;  %v2525_v16 = vmul.f32 %v2477_v53, %v4504_v54 }
 0x2af   :  { %v2312_v15 = vmul.f32 0.010204081, %v2263_v7  ;;  %2256 = vadd.xlane.f32.xlu0 %v2209_v10  ;;  %v2168_v21 = vadd.f32 %v2127_v14, %v1308_v5  ;;  %v2407_v35 = vadd.f32 0.001, %v2383_v38  ;;  %v2502_v14 = vld [vmem:[%s4787_s4 + $0x18] sm:$0xff] }
 0x2b0   :  { %v1310_v18 = vpop.xlane.xlu0 %1309  ;;  %v2549_v29 = vsub.f32 %v2501_v57, %v2525_v16 }
 0x2b1   :  { %v2360_v19 = vsub.f32 %v2312_v15, %v2336_v43  ;;  %v4534_v32 = vmul.f32 0.010204081, %v2168_v21  ;;  %v3654_v27 = vpop.eup %3653  ;;  %v2547_v43 = vsub.f32 %v2499_v2, %v2523_v4 }
 0x2b2   :  { %v1404_v25 = vpop.xlane.xlu1 %1403  ;;  %v2478_v55 = vmul.f32 %v3654_v27, %v2454_v36 }
 0x2b3   :  { %v2384_v26 = vmax.f32 %v2360_v19, 0.0  ;;  %v2337_v17 = vmul.f32 %v4534_v32, %v4534_v32 }
 0x2b4   :  { %v2129_v28 = vpop.xlane.xlu0 %2128  ;;  %v2526_v7 = vmul.f32 %v2478_v55, %v4506_v22 }
 0x2b5   :  { %v2408_v34 = vadd.f32 0.001, %v2384_v26  ;;  %v2169_v13 = vadd.f32 %v2129_v28, %v1310_v18 }
 0x2b6   :  { %v2223_v39 = vpop.xlane.xlu1 %2222  ;;  %v2550_v19 = vsub.f32 %v2502_v14, %v2526_v7 }
 0x2b7   :  { %v2264_v44 = vadd.f32 %v2223_v39, %v1404_v25  ;;  %3655 = vrsqrt.f32 %v2408_v34  ;;  %v4545_v58 = vmul.f32 0.010204081, %v2169_v13 }
 0x2b8   :  { %v1406_v45 = vpop.xlane.xlu0 %1405  ;;  %3657 = vrsqrt.f32 %v2407_v35 }
 0x2b9   :  { %v2313_v50 = vmul.f32 0.010204081, %v2264_v44  ;;  %v2338_v47 = vmul.f32 %v4545_v58, %v4545_v58  ;;  %v2504_v44 = vld [vmem:[%s4787_s4 + $0x28] sm:$0xff] }
 0x2ba   :  { %2597 = vperm.xlu1 %3354, %v2475_v46   ;;  %v1312_v56 = vpop.xlane.xlu1 %1311 }
 0x2bb   :  { %v2361_v23 = vsub.f32 %v2313_v50, %v2337_v17  ;;  %v2458_v50 = vld [vmem:[%s4786_s3 + $0x38] sm:$0xff] }
 0x2bc   :  { %v2225_v59 = vpop.xlane.xlu0 %2224 }
 0x2bd   :  { %v2265_v8 = vadd.f32 %v2225_v59, %v1406_v45  ;;  %v2385_v37 = vmax.f32 %v2361_v23, 0.0  ;;  %v2503_v23 = vld [vmem:[%s4787_s4 + $0x20] sm:$0xff] }
 0x2be   :  { %2746 = vperm.xlu1 %3354, %v2548_v40   ;;  %v2131_v41 = vpop.xlane.xlu1 %2130 }
 0x2bf   :  { %v2314_v48 = vmul.f32 0.010204081, %v2265_v8  ;;  %v2170_v60 = vadd.f32 %v2131_v41, %v1312_v56  ;;  %v2409_v0 = vadd.f32 0.001, %v2385_v37  ;;  %v2506_v37 = vld [vmem:[%s4787_s4 + $0x38] sm:$0xff] }
 0x2c0   :  { %v1314_v52 = vpop.xlane.xlu0 %1313 }
 0x2c1   :  { %v2362_v62 = vsub.f32 %v2314_v48, %v2338_v47  ;;  %v3656_v10 = vpop.eup %3655  ;;  %v4560_v12 = vmul.f32 0.010204081, %v2170_v60  ;;  %3659 = vrsqrt.f32 %v2409_v0 }
 0x2c2   :  { %2607 = vperm.xlu1 %3354, %v2477_v53   ;;  %v1408_v1 = vpop.xlane.xlu1 %1407  ;;  %v3658_v18 = vpop.eup %3657  ;;  %v2480_v21 = vmul.f32 %v3656_v10, %v2456_v9 }
 0x2c3   :  { %v2386_v5 = vmax.f32 %v2362_v62, 0.0  ;;  %v2339_v25 = vmul.f32 %v4560_v12, %v4560_v12  ;;  %v2479_v33 = vmul.f32 %v3658_v18, %v2455_v24  ;;  %v2507_v24 = vld [vmem:[%s4787_s4 + $0x40] sm:$0xff] }
 0x2c4   :  { %v2133_v6 = vpop.xlane.xlu0 %2132  ;;  %v2528_v39 = vmul.f32 %v2480_v21, %v4521_v42 }
 0x2c5   :  { %v2410_v11 = vadd.f32 0.001, %v2386_v5  ;;  %2602 = vperm.xlu0 %3353, %v2476_v30   ;;  %v2171_v15 = vadd.f32 %v2133_v6, %v1314_v52  ;;  %v2527_v42 = vmul.f32 %v2479_v33, %v4523_v63  ;;  %v2505_v5 = vld [vmem:[%s4787_s4 + $0x30] sm:$0xff]  ;;  %v2459_v6 = vld [vmem:[%s4786_s3 + $0x40] sm:$0xff] }
 0x2c6   :  { %2612 = vperm.xlu1 %3354, %v2478_v55   ;;  %v2227_v3 = vpop.xlane.xlu1 %2226  ;;  %v2552_v56 = vsub.f32 %v2504_v44, %v2528_v39  ;;  %v2508_v39 = vld [vmem:[%s4787_s4 + $0x48] sm:$0xff] }
 0x2c7   :  { %3661 = vrsqrt.f32 %v2410_v11  ;;  %v2266_v22 = vadd.f32 %v2227_v3, %v1408_v1  ;;  %v4577_v54 = vmul.f32 0.010204081, %v2171_v15  ;;  %v2551_v36 = vsub.f32 %v2503_v23, %v2527_v42 }
 0x2c8   :  { %v1410_v20 = vpop.xlane.xlu0 %1409 }
 0x2c9   :  { %v2315_v26 = vmul.f32 0.010204081, %v2266_v22  ;;  %2741 = vperm.xlu0 %3353, %v2547_v43   ;;  %v2340_v46 = vmul.f32 %v4577_v54, %v4577_v54 }
 0x2ca   :  { %2756 = vperm.xlu1 %3354, %v2550_v19   ;;  %v1316_v28 = vpop.xlane.xlu1 %1315  ;;  %v2460_v19 = vld [vmem:[%s4786_s3 + $0x48] sm:$0xff] }
 0x2cb   :  { %v2363_v30 = vsub.f32 %v2315_v26, %v2339_v25  ;;  %v3660_v51 = vpop.eup %3659 }
 0x2cc   :  { %v2229_v38 = vpop.xlane.xlu0 %2228  ;;  %v2481_v41 = vmul.f32 %v3660_v51, %v2457_v61 }
 0x2cd   :  { %v2387_v34 = vmax.f32 %v2363_v30, 0.0  ;;  %v2267_v13 = vadd.f32 %v2229_v38, %v1410_v20  ;;  %2751 = vperm.xlu0 %3353, %v2549_v29  }
 0x2ce   :  { %2622 = vperm.xlu1 %3354, %v2480_v21   ;;  %v2135_v45 = vpop.xlane.xlu1 %2134  ;;  %v2529_v1 = vmul.f32 %v2481_v41, %v4534_v32 }
 0x2cf   :  { %v2411_v49 = vadd.f32 0.001, %v2387_v34  ;;  %v2316_v17 = vmul.f32 0.010204081, %v2267_v13  ;;  %v2172_v27 = vadd.f32 %v2135_v45, %v1316_v28 }
 0x2d0   :  { %v1318_v35 = vpop.xlane.xlu0 %1317  ;;  %v2553_v14 = vsub.f32 %v2505_v5, %v2529_v1 }
 0x2d1   :  { %v3662_v59 = vpop.eup %3661  ;;  %3663 = vrsqrt.f32 %v2411_v49  ;;  %v2364_v40 = vsub.f32 %v2316_v17, %v2340_v46  ;;  %2617 = vperm.xlu0 %3353, %v2479_v33   ;;  %v4599_v53 = vmul.f32 0.010204081, %v2172_v27 }
 0x2d2   :  { %2766 = vperm.xlu1 %3354, %v2552_v56   ;;  %v1412_v8 = vpop.xlane.xlu1 %1411  ;;  %v2482_v31 = vmul.f32 %v3662_v59, %v2458_v50 }
 0x2d3   :  { %v2388_v63 = vmax.f32 %v2364_v40, 0.0 }
 0x2d4   :  { %v2137_v47 = vpop.xlane.xlu0 %2136  ;;  %v2530_v48 = vmul.f32 %v2482_v31, %v4545_v58  ;;  %v2341_v58 = vmul.f32 %v4599_v53, %v4599_v53 }
 0x2d5   :  { %v2412_v52 = vadd.f32 0.001, %v2388_v63  ;;  %2761 = vperm.xlu0 %3353, %v2551_v36   ;;  %v2173_v60 = vadd.f32 %v2137_v47, %v1318_v35  ;;  %v2461_v35 = vld [vmem:[%s4786_s3 + $0x50] sm:$0xff] }
 0x2d6   :  { %2632 = vperm.xlu1 %3354, %v2482_v31   ;;  %v2231_v55 = vpop.xlane.xlu1 %2230  ;;  %v2554_v62 = vsub.f32 %v2506_v37, %v2530_v48  ;;  %v2509_v31 = vld [vmem:[%s4787_s4 + $0x50] sm:$0xff]  ;;  %v2462_v48 = vld [vmem:[%s4786_s3 + $0x58] sm:$0xff] }
 0x2d7   :  { %3665 = vrsqrt.f32 %v2412_v52  ;;  %v2268_v0 = vadd.f32 %v2231_v55, %v1412_v8  ;;  %v4610_v11 = vmul.f32 0.010204081, %v2173_v60 }
 0x2d8   :  { %v1414_v4 = vpop.xlane.xlu0 %1413 }
 0x2d9   :  { %v2317_v2 = vmul.f32 0.010204081, %v2268_v0  ;;  %2627 = vperm.xlu0 %3353, %v2481_v41   ;;  %v2342_v16 = vmul.f32 %v4610_v11, %v4610_v11 }
 0x2da   :  { %2776 = vperm.xlu1 %3354, %v2554_v62   ;;  %v1320_v7 = vpop.xlane.xlu1 %1319 }
 0x2db   :  { %v3664_v10 = vpop.eup %3663  ;;  %v2365_v32 = vsub.f32 %v2317_v2, %v2341_v58 }
 0x2dc   :  { %v2233_v9 = vpop.xlane.xlu0 %2232  ;;  %v2483_v3 = vmul.f32 %v3664_v10, %v2459_v6 }
 0x2dd   :  { %v2389_v43 = vmax.f32 %v2365_v32, 0.0  ;;  %v2269_v15 = vadd.f32 %v2233_v9, %v1414_v4  ;;  %2771 = vperm.xlu0 %3353, %v2553_v14  }
 0x2de   :  { %v2139_v22 = vpop.xlane.xlu1 %2138  ;;  %v2531_v21 = vmul.f32 %v2483_v3, %v4560_v12 }
 0x2df   :  { %v2413_v18 = vadd.f32 0.001, %v2389_v43  ;;  %v2318_v20 = vmul.f32 0.010204081, %v2269_v15  ;;  %v2174_v28 = vadd.f32 %v2139_v22, %v1320_v7  ;;  %v2463_v22 = vld [vmem:[%s4786_s3 + $0x60] sm:$0xff] }
 0x2e0   :  { %v1322_v57 = vpop.xlane.xlu0 %1321  ;;  %v2555_v38 = vsub.f32 %v2507_v24, %v2531_v21 }
 0x2e1   :  { %v3666_v25 = vpop.eup %3665  ;;  %3667 = vrsqrt.f32 %v2413_v18  ;;  %v2366_v26 = vsub.f32 %v2318_v20, %v2342_v16  ;;  %2637 = vperm.xlu0 %3353, %v2483_v3   ;;  %v4625_v44 = vmul.f32 0.010204081, %v2174_v28 }
 0x2e2   :  { %v1416_v30 = vpop.xlane.xlu1 %1415  ;;  %v2484_v29 = vmul.f32 %v3666_v25, %v2460_v19  ;;  %v2511_v25 = vld [vmem:[%s4787_s4 + $0x60] sm:$0xff] }
 0x2e3   :  { %v2390_v33 = vmax.f32 %v2366_v26, 0.0  ;;  %v2343_v42 = vmul.f32 %v4625_v44, %v4625_v44 }
 0x2e4   :  { %v2141_v34 = vpop.xlane.xlu0 %2140  ;;  %2642 = vperm.xlu1 %3354, %v2484_v29   ;;  %v2532_v12 = vmul.f32 %v2484_v29, %v4577_v54 }
 0x2e5   :  { %v2414_v13 = vadd.f32 0.001, %v2390_v33  ;;  %2781 = vperm.xlu0 %3353, %v2555_v38   ;;  %v2175_v49 = vadd.f32 %v2141_v34, %v1322_v57  ;;  %v2464_v38 = vld [vmem:[%s4786_s3 + $0x68] sm:$0xff] }
 0x2e6   :  { %v2235_v45 = vpop.xlane.xlu1 %2234  ;;  %v2556_v46 = vsub.f32 %v2508_v39, %v2532_v12 }
 0x2e7   :  { %3669 = vrsqrt.f32 %v2414_v13  ;;  %v2270_v17 = vadd.f32 %v2235_v45, %v1416_v30  ;;  %v4632_v23 = vmul.f32 0.010204081, %v2175_v49 }
 0x2e8   :  { %v1418_v50 = vpop.xlane.xlu0 %1417  ;;  %2786 = vperm.xlu1 %3354, %v2556_v46  }
 0x2e9   :  { %v2319_v51 = vmul.f32 0.010204081, %v2270_v17  ;;  %v2344_v37 = vmul.f32 %v4632_v23, %v4632_v23 }
 0x2ea   :  { %v1324_v54 = vpop.xlane.xlu1 %1323 }
 0x2eb   :  { %v3668_v56 = vpop.eup %3667  ;;  %v2367_v61 = vsub.f32 %v2319_v51, %v2343_v42 }
 0x2ec   :  { %v2237_v59 = vpop.xlane.xlu0 %2236  ;;  %v2485_v40 = vmul.f32 %v3668_v56, %v2461_v35 }
 0x2ed   :  { %v2391_v27 = vmax.f32 %v2367_v61, 0.0  ;;  %v2271_v8 = vadd.f32 %v2237_v59, %v1418_v50 }
 0x2ee   :  { %2647 = vperm.xlu0 %3353, %v2485_v40   ;;  %v2143_v63 = vpop.xlane.xlu1 %2142  ;;  %v2533_v36 = vmul.f32 %v2485_v40, %v4599_v53  ;;  %v2510_v53 = vld [vmem:[%s4787_s4 + $0x58] sm:$0xff] }
 0x2ef   :  { %v2415_v41 = vadd.f32 0.001, %v2391_v27  ;;  %v2320_v47 = vmul.f32 0.010204081, %v2271_v8  ;;  %v2176_v0 = vadd.f32 %v2143_v63, %v1324_v54 }
 0x2f0   :  { %v1326_v52 = vpop.xlane.xlu0 %1325  ;;  %v2557_v55 = vsub.f32 %v2509_v31, %v2533_v36  ;;  %v2465_v31 = vld [vmem:[%s4786_s3 + $0x70] sm:$0xff] }
 0x2f1   :  { %v3670_v62 = vpop.eup %3669  ;;  %3671 = vrsqrt.f32 %v2415_v41  ;;  %v2368_v60 = vsub.f32 %v2320_v47, %v2344_v37  ;;  %v4647_v7 = vmul.f32 0.010204081, %v2176_v0 }
 0x2f2   :  { %2791 = vperm.xlu0 %3353, %v2557_v55   ;;  %v1420_v1 = vpop.xlane.xlu1 %1419  ;;  %v2486_v4 = vmul.f32 %v3670_v62, %v2462_v48  ;;  %v2513_v55 = vld [vmem:[%s4787_s4 + $0x70] sm:$0xff] }
 0x2f3   :  { %v2392_v5 = vmax.f32 %v2368_v60, 0.0  ;;  %v2345_v43 = vmul.f32 %v4647_v7, %v4647_v7 }
 0x2f4   :  { %v2145_v58 = vpop.xlane.xlu0 %2144  ;;  %2652 = vperm.xlu1 %3354, %v2486_v4   ;;  %v2534_v2 = vmul.f32 %v2486_v4, %v4610_v11 }
 0x2f5   :  { %v2416_v6 = vadd.f32 0.001, %v2392_v5  ;;  %v2177_v14 = vadd.f32 %v2145_v58, %v1326_v52  ;;  %v2466_v5 = vld [vmem:[%s4786_s3 + $0x78] sm:$0xff] }
 0x2f6   :  { %v2239_v10 = vpop.xlane.xlu1 %2238  ;;  %v2558_v32 = vsub.f32 %v2510_v53, %v2534_v2 }
 0x2f7   :  { %3673 = vrsqrt.f32 %v2416_v6  ;;  %v2272_v9 = vadd.f32 %v2239_v10, %v1420_v1  ;;  %v4654_v18 = vmul.f32 0.010204081, %v2177_v14 }
 0x2f8   :  { %v1422_v3 = vpop.xlane.xlu0 %1421  ;;  %2796 = vperm.xlu1 %3354, %v2558_v32  }
 0x2f9   :  { %v2321_v15 = vmul.f32 0.010204081, %v2272_v9  ;;  %v2346_v30 = vmul.f32 %v4654_v18, %v4654_v18 }
 0x2fa   :  { %v1328_v16 = vpop.xlane.xlu1 %1327 }
 0x2fb   :  { %v3672_v11 = vpop.eup %3671  ;;  %v2369_v20 = vsub.f32 %v2321_v15, %v2345_v43 }
 0x2fc   :  { %v2241_v19 = vpop.xlane.xlu0 %2240  ;;  %v2487_v21 = vmul.f32 %v3672_v11, %v2463_v22 }
 0x2fd   :  { %v2393_v57 = vmax.f32 %v2369_v20, 0.0  ;;  %v2273_v24 = vadd.f32 %v2241_v19, %v1422_v3 }
 0x2fe   :  { %2657 = vperm.xlu0 %3353, %v2487_v21   ;;  %v2147_v26 = vpop.xlane.xlu1 %2146  ;;  %v2535_v28 = vmul.f32 %v2487_v21, %v4625_v44  ;;  %v2512_v44 = vld [vmem:[%s4787_s4 + $0x68] sm:$0xff] }
 0x2ff   :  { %v2417_v29 = vadd.f32 0.001, %v2393_v57  ;;  %v2322_v33 = vmul.f32 0.010204081, %v2273_v24  ;;  %v2178_v45 = vadd.f32 %v2147_v26, %v1328_v16 }
 0x300   :  { %v1330_v39 = vpop.xlane.xlu0 %1329  ;;  %v2559_v34 = vsub.f32 %v2511_v25, %v2535_v28  ;;  %v2467_v25 = vld [vmem:[%s4786_s3 + $0x80] sm:$0xff] }
 0x301   :  { %v3674_v12 = vpop.eup %3673  ;;  %3675 = vrsqrt.f32 %v2417_v29  ;;  %v2370_v13 = vsub.f32 %v2322_v33, %v2346_v30  ;;  %v4669_v35 = vmul.f32 0.010204081, %v2178_v45 }
 0x302   :  { %2801 = vperm.xlu0 %3353, %v2559_v34   ;;  %v1424_v46 = vpop.xlane.xlu1 %1423  ;;  %v2488_v49 = vmul.f32 %v3674_v12, %v2464_v38  ;;  %v2515_v34 = vld [vmem:[%s4787_s4 + $0x80] sm:$0xff] }
 0x303   :  { %v2394_v17 = vmax.f32 %v2370_v13, 0.0  ;;  %v2347_v27 = vmul.f32 %v4669_v35, %v4669_v35 }
 0x304   :  { %v2149_v50 = vpop.xlane.xlu0 %2148  ;;  %2662 = vperm.xlu1 %3354, %v2488_v49   ;;  %v2536_v42 = vmul.f32 %v2488_v49, %v4632_v23 }
 0x305   :  { %v2418_v51 = vadd.f32 0.001, %v2394_v17  ;;  %v2179_v61 = vadd.f32 %v2149_v50, %v1330_v39  ;;  %v2468_v17 = vld [vmem:[%s4786_s3 + $0x88] sm:$0xff] }
 0x306   :  { %v2243_v54 = vpop.xlane.xlu1 %2242  ;;  %v2560_v56 = vsub.f32 %v2512_v44, %v2536_v42 }
 0x307   :  { %3677 = vrsqrt.f32 %v2418_v51  ;;  %v2274_v59 = vadd.f32 %v2243_v54, %v1424_v46  ;;  %v4676_v36 = vmul.f32 0.010204081, %v2179_v61 }
 0x308   :  { %v1426_v40 = vpop.xlane.xlu0 %1425  ;;  %2806 = vperm.xlu1 %3354, %v2560_v56  }
 0x309   :  { %v2323_v8 = vmul.f32 0.010204081, %v2274_v59  ;;  %v2348_v0 = vmul.f32 %v4676_v36, %v4676_v36 }
 0x30a   :  { %v1332_v63 = vpop.xlane.xlu1 %1331 }
 0x30b   :  { %v3676_v23 = vpop.eup %3675  ;;  %v2371_v37 = vsub.f32 %v2323_v8, %v2347_v27 }
 0x30c   :  { %v2245_v41 = vpop.xlane.xlu0 %2244  ;;  %v2489_v47 = vmul.f32 %v3676_v23, %v2465_v31 }
 0x30d   :  { %v2395_v48 = vmax.f32 %v2371_v37, 0.0  ;;  %v2275_v52 = vadd.f32 %v2245_v41, %v1426_v40 }
 0x30e   :  { %2667 = vperm.xlu0 %3353, %v2489_v47   ;;  %v2151_v62 = vpop.xlane.xlu1 %2150  ;;  %v2537_v60 = vmul.f32 %v2489_v47, %v4647_v7  ;;  %v2514_v7 = vld [vmem:[%s4787_s4 + $0x78] sm:$0xff] }
 0x30f   :  { %v2419_v1 = vadd.f32 0.001, %v2395_v48  ;;  %v2324_v4 = vmul.f32 0.010204081, %v2275_v52  ;;  %v2180_v10 = vadd.f32 %v2151_v62, %v1332_v63 }
 0x310   :  { %v1334_v53 = vpop.xlane.xlu0 %1333  ;;  %v2561_v58 = vsub.f32 %v2513_v55, %v2537_v60  ;;  %v2469_v55 = vld [vmem:[%s4786_s3 + $0x90] sm:$0xff] }
 0x311   :  { %v3678_v2 = vpop.eup %3677  ;;  %3679 = vrsqrt.f32 %v2419_v1  ;;  %v2372_v6 = vsub.f32 %v2324_v4, %v2348_v0  ;;  %v4691_v22 = vmul.f32 0.010204081, %v2180_v10 }
 0x312   :  { %2811 = vperm.xlu0 %3353, %v2561_v58   ;;  %v1428_v32 = vpop.xlane.xlu1 %1427  ;;  %v2490_v14 = vmul.f32 %v3678_v2, %v2466_v5  ;;  %v2517_v58 = vld [vmem:[%s4787_s4 + $0x90] sm:$0xff] }
 0x313   :  { %v2396_v9 = vmax.f32 %v2372_v6, 0.0  ;;  %v2349_v57 = vmul.f32 %v4691_v22, %v4691_v22 }
 0x314   :  { %v2153_v3 = vpop.xlane.xlu0 %2152  ;;  %2672 = vperm.xlu1 %3354, %v2490_v14   ;;  %v2538_v43 = vmul.f32 %v2490_v14, %v4654_v18 }
 0x315   :  { %v2420_v15 = vadd.f32 0.001, %v2396_v9  ;;  %v2181_v20 = vadd.f32 %v2153_v3, %v1334_v53  ;;  %v2470_v9 = vld [vmem:[%s4786_s3 + $0x98] sm:$0xff] }
 0x316   :  { %v2247_v16 = vpop.xlane.xlu1 %2246  ;;  %v2562_v11 = vsub.f32 %v2514_v7, %v2538_v43 }
 0x317   :  { %3681 = vrsqrt.f32 %v2420_v15  ;;  %v2276_v19 = vadd.f32 %v2247_v16, %v1428_v32  ;;  %v4698_v28 = vmul.f32 0.010204081, %v2181_v20 }
 0x318   :  { %v1430_v21 = vpop.xlane.xlu0 %1429  ;;  %2816 = vperm.xlu1 %3354, %v2562_v11  }
 0x319   :  { %v2325_v24 = vmul.f32 0.010204081, %v2276_v19  ;;  %v2350_v45 = vmul.f32 %v4698_v28, %v4698_v28 }
 0x31a   :  { %v1336_v26 = vpop.xlane.xlu1 %1335 }
 0x31b   :  { %v3680_v18 = vpop.eup %3679  ;;  %v2373_v30 = vsub.f32 %v2325_v24, %v2349_v57 }
 0x31c   :  { %v2249_v29 = vpop.xlane.xlu0 %2248  ;;  %v2491_v33 = vmul.f32 %v3680_v18, %v2467_v25 }
 0x31d   :  { %v2397_v38 = vmax.f32 %v2373_v30, 0.0  ;;  %v2277_v39 = vadd.f32 %v2249_v29, %v1430_v21 }
 0x31e   :  { %2677 = vperm.xlu0 %3353, %v2491_v33   ;;  %v2155_v12 = vpop.xlane.xlu1 %2154  ;;  %v2539_v13 = vmul.f32 %v2491_v33, %v4669_v35  ;;  %v2516_v35 = vld [vmem:[%s4787_s4 + $0x88] sm:$0xff] }
 0x31f   :  { %v2421_v46 = vadd.f32 0.001, %v2397_v38  ;;  %v2326_v49 = vmul.f32 0.010204081, %v2277_v39  ;;  %v2182_v54 = vadd.f32 %v2155_v12, %v1336_v26 }
 0x320   :  { %v1338_v44 = vpop.xlane.xlu0 %1337  ;;  %v2563_v50 = vsub.f32 %v2515_v34, %v2539_v13  ;;  %v2471_v34 = vld [vmem:[%s4786_s3 + $0xa0] sm:$0xff] }
 0x321   :  { %v3682_v42 = vpop.eup %3681  ;;  %3683 = vrsqrt.f32 %v2421_v46  ;;  %v2374_v51 = vsub.f32 %v2326_v49, %v2350_v45  ;;  %v4713_v31 = vmul.f32 0.010204081, %v2182_v54 }
 0x322   :  { %2821 = vperm.xlu0 %3353, %v2563_v50   ;;  %v1432_v56 = vpop.xlane.xlu1 %1431  ;;  %v2492_v61 = vmul.f32 %v3682_v42, %v2468_v17  ;;  %v2519_v50 = vld [vmem:[%s4787_s4 + $0xa0] sm:$0xff] }
 0x323   :  { %v2398_v59 = vmax.f32 %v2374_v51, 0.0  ;;  %v2351_v48 = vmul.f32 %v4713_v31, %v4713_v31 }
 0x324   :  { %v2157_v40 = vpop.xlane.xlu0 %2156  ;;  %2682 = vperm.xlu1 %3354, %v2492_v61   ;;  %v2540_v27 = vmul.f32 %v2492_v61, %v4676_v36 }
 0x325   :  { %v2422_v8 = vadd.f32 0.001, %v2398_v59  ;;  %v2183_v37 = vadd.f32 %v2157_v40, %v1338_v44  ;;  %v2472_v59 = vld [vmem:[%s4786_s3 + $0xa8] sm:$0xff] }
 0x326   :  { %v2251_v63 = vpop.xlane.xlu1 %2250  ;;  %v2564_v23 = vsub.f32 %v2516_v35, %v2540_v27 }
 0x327   :  { %3685 = vrsqrt.f32 %v2422_v8  ;;  %v2278_v41 = vadd.f32 %v2251_v63, %v1432_v56  ;;  %v4720_v60 = vmul.f32 0.010204081, %v2183_v37  ;;  %v2572_v37 = vld [vmem:[#allocation2 + $0x8] sm:$0xff] }
 0x328   :  { %v1434_v47 = vpop.xlane.xlu0 %1433  ;;  %2826 = vperm.xlu1 %3354, %v2564_v23  }
 0x329   :  { %v2327_v52 = vmul.f32 0.010204081, %v2278_v41  ;;  %v2352_v10 = vmul.f32 %v4720_v60, %v4720_v60  ;;  %v2908_v41 = vld [vmem:[#allocation2 + $0xc8] sm:$0xff] }
 0x32a   :  { %v1340_v62 = vpop.xlane.xlu1 %1339 }
 0x32b   :  { %v3684_v36 = vpop.eup %3683  ;;  %v2375_v0 = vsub.f32 %v2327_v52, %v2351_v48  ;;  %v2571_v52 = vld [vmem:[#allocation2] sm:$0xff] }
 0x32c   :  { %v2253_v1 = vpop.xlane.xlu0 %2252  ;;  %v2493_v4 = vmul.f32 %v3684_v36, %v2469_v55 }
 0x32d   :  { %v2399_v5 = vmax.f32 %v2375_v0, 0.0  ;;  %v2279_v53 = vadd.f32 %v2253_v1, %v1434_v47  ;;  %v2907_v0 = vld [vmem:[#allocation2 + $0xc0] sm:$0xff] }
 0x32e   :  { %2687 = vperm.xlu0 %3353, %v2493_v4   ;;  %v2159_v2 = vpop.xlane.xlu1 %2158  ;;  %v2541_v6 = vmul.f32 %v2493_v4, %v4691_v22  ;;  %v2518_v22 = vld [vmem:[%s4787_s4 + $0x98] sm:$0xff] }
 0x32f   :  { %v2423_v32 = vadd.f32 0.001, %v2399_v5  ;;  %v2328_v14 = vmul.f32 0.010204081, %v2279_v53  ;;  %v2184_v16 = vadd.f32 %v2159_v2, %v1340_v62 }
 0x330   :  { %v1342_v7 = vpop.xlane.xlu0 %1341  ;;  %v2565_v3 = vsub.f32 %v2517_v58, %v2541_v6  ;;  %v2574_v6 = vld [vmem:[#allocation2 + $0x18] sm:$0xff] }
 0x331   :  { %v3686_v43 = vpop.eup %3685  ;;  %3687 = vrsqrt.f32 %v2423_v32  ;;  %v2376_v15 = vsub.f32 %v2328_v14, %v2352_v10  ;;  %v4735_v25 = vmul.f32 0.010204081, %v2184_v16  ;;  %v2910_v10 = vld [vmem:[#allocation2 + $0xd8] sm:$0xff] }
 0x332   :  { %2831 = vperm.xlu0 %3353, %v2565_v3   ;;  %v1436_v11 = vpop.xlane.xlu1 %1435  ;;  %v2494_v20 = vmul.f32 %v3686_v43, %v2470_v9  ;;  %v2473_v3 = vld [vmem:[%s4786_s3 + $0xb0] sm:$0xff] }
 0x333   :  { %v2400_v19 = vmax.f32 %v2376_v15, 0.0  ;;  %v2353_v38 = vmul.f32 %v4735_v25, %v4735_v25  ;;  %v2573_v43 = vld [vmem:[#allocation2 + $0x10] sm:$0xff] }
 0x334   :  { %v2161_v21 = vpop.xlane.xlu0 %2160  ;;  %2692 = vperm.xlu1 %3354, %v2494_v20   ;;  %v2542_v57 = vmul.f32 %v2494_v20, %v4698_v28  ;;  %v2909_v15 = vld [vmem:[#allocation2 + $0xd0] sm:$0xff] }
 0x335   :  { %v2424_v24 = vadd.f32 0.001, %v2400_v19  ;;  %v2185_v30 = vadd.f32 %v2161_v21, %v1342_v7 }
 0x336   :  { %v2255_v26 = vpop.xlane.xlu1 %2254  ;;  %v2566_v18 = vsub.f32 %v2518_v22, %v2542_v57 }
 0x337   :  { %3689 = vrsqrt.f32 %v2424_v24  ;;  %v2280_v29 = vadd.f32 %v2255_v26, %v1436_v11  ;;  %v4742_v13 = vmul.f32 0.010204081, %v2185_v30  ;;  %v2521_v30 = vld [vmem:[%s4787_s4 + $0xb0] sm:$0xff] }
 0x338   :  { %v1438_v33 = vpop.xlane.xlu0 %1437  ;;  %2836 = vperm.xlu1 %3354, %v2566_v18  }
 0x339   :  { %v2329_v39 = vmul.f32 0.010204081, %v2280_v29  ;;  %v2354_v54 = vmul.f32 %v4742_v13, %v4742_v13 }
 0x33a   :  { %v2598_v12 = vpop.permute.xlu1 %2597 }
 0x33b   :  { %v3688_v28 = vpop.eup %3687  ;;  %v2377_v45 = vsub.f32 %v2329_v39, %v2353_v38  ;;  %v2715_v1 = vmul.f32 %v2598_v12, %v2571_v52  ;;  %v2931_v53 = vmul.f32 %v2907_v0, %v2598_v12  ;;  %v2474_v38 = vld [vmem:[%s4786_s3 + $0xb8] sm:$0xff]  ;;  %v2576_v39 = vld [vmem:[#allocation2 + $0x28] sm:$0xff]  ;;  %v2913_v52 = vld [vmem:[#allocation2 + $0xf0] sm:$0xff]  ;;  %s3722_s3 = smov [#allocation2]  }
 0x33c   :  { %v2257_v46 = vpop.xlane.xlu0 %2256  ;;  %v2495_v49 = vmul.f32 %v3688_v28, %v2471_v34  ;;  %v2912_v34 = vld [vmem:[#allocation2 + $0xe8] sm:$0xff] }
 0x33d   :  { %v2401_v17 = vmax.f32 %v2377_v45, 0.0  ;;  %v2281_v44 = vadd.f32 %v2257_v46, %v1438_v33 }
 0x33e   :  { %2697 = vperm.xlu0 %3353, %v2495_v49   ;;  %v2747_v42 = vpop.permute.xlu1 %2746  ;;  %v2543_v51 = vmul.f32 %v2495_v49, %v4713_v31  ;;  %v2520_v31 = vld [vmem:[%s4787_s4 + $0xa8] sm:$0xff] }
 0x33f   :  { %v2425_v56 = vadd.f32 0.001, %v2401_v17  ;;  %v2330_v61 = vmul.f32 0.010204081, %v2281_v44  ;;  %v2575_v17 = vld [vmem:[#allocation2 + $0x20] sm:$0xff] }
 0x340   :  { %v2567_v35 = vsub.f32 %v2519_v50, %v2543_v51  ;;  %v2911_v44 = vld [vmem:[#allocation2 + $0xe0] sm:$0xff] }
 0x341   :  { %v3690_v40 = vpop.eup %3689  ;;  %3691 = vrsqrt.f32 %v2425_v56  ;;  %v2378_v27 = vsub.f32 %v2330_v61, %v2354_v54  ;;  %v2522_v61 = vld [vmem:[%s4787_s4 + $0xb8] sm:$0xff]  ;;  %s3008_s4 = sshll.u32 %s3722_s3, 4  ;;  %s3009_s4 = int_to_ptr.vmem [resolvable:$true] %s3008_s4 }
 0x342   :  { %2841 = vperm.xlu0 %3353, %v2567_v35   ;;  %v2608_v8 = vpop.permute.xlu1 %2607  ;;  %v2496_v63 = vmul.f32 %v3690_v40, %v2472_v59  ;;  %s3695_s22 = scalar_lea.vmem %s3009_s4, 6144  ;;  %p3700_p1 = scmp.lt.s32.totalorder %s3009_s4, %s3009_s4 }
 0x343   :  { %v2402_v23 = vmax.f32 %v2378_v27, 0.0  ;;  %v2717_v20 = vmul.f32 %v2608_v8, %v2573_v43  ;;  %v2933_v19 = vmul.f32 %v2909_v15, %v2608_v8  ;;  %p3696_p0 = scmp.ne.s32.totalorder %s3009_s4, %s3695_s22  ;;  %p3701_p2 = scmp.lt.s32.totalorder %s3695_s22, %s3695_s22 }
 0x344   :  { %v2603_v47 = vpop.permute.xlu0 %2602  ;;  %2702 = vperm.xlu1 %3354, %v2496_v63   ;;  %v2544_v48 = vmul.f32 %v2496_v63, %v4720_v60 }
 0x345   :  { %v2426_v55 = vadd.f32 0.001, %v2402_v23  ;;  %v2716_v62 = vmul.f32 %v2603_v47, %v2572_v37  ;;  %v2932_v36 = vmul.f32 %v2908_v41, %v2603_v47  ;;  %v2578_v23 = vld [vmem:[#allocation2 + $0x38] sm:$0xff]  ;;  %p3702_p3 = por %p3701_p2, %p3700_p1 }
 0x346   :  { %v2613_v4 = vpop.permute.xlu1 %2612  ;;  %v2568_v5 = vsub.f32 %v2520_v31, %v2544_v48  ;;  %v2914_v31 = vld [vmem:[#allocation2 + $0xf8] sm:$0xff]  ;;  %v2577_v48 = vld [vmem:[#allocation2 + $0x30] sm:$0xff] }
 0x347   :  { %3693 = vrsqrt.f32 %v2426_v55  ;;  %v2860_v58 = vadd.f32 %v2747_v42, %v2716_v62  ;;  %v2956_v2 = vadd.f32 %v2932_v36, %v2747_v42  ;;  %v2718_v14 = vmul.f32 %v2613_v4, %v2574_v6  ;;  %p3703_p4 = pnand %p3702_p3, %p3696_p0 }
 0x348   :  { %v2742_v32 = vpop.permute.xlu0 %2741  ;;  %2846 = vperm.xlu1 %3354, %v2568_v5   ;;  %v2934_v60 = vmul.f32 %v2910_v10, %v2613_v4 }
 0x349   :  { %2884 = vst [vmem:[#allocation2 + $0x8] sm:$0xff] %v2860_v58  ;;  %2980 = vst [vmem:[#allocation2 + $0xc8] sm:$0xff] %v2956_v2  ;;  %v2859_v9 = vadd.f32 %v2742_v32, %v2715_v1  ;;  %v2955_v7 = vadd.f32 %v2931_v53, %v2742_v32  ;;  %v2579_v58 = vld [vmem:[#allocation2 + $0x40] sm:$0xff] }
 0x34a   :  { %v2757_v16 = vpop.permute.xlu1 %2756  ;;  %v2915_v2 = vld [vmem:[#allocation2 + $0x100] sm:$0xff] }
 0x34b   :  { %v3692_v11 = vpop.eup %3691  ;;  %2883 = vst [vmem:[#allocation2] sm:$0xff] %v2859_v9  ;;  %2979 = vst [vmem:[#allocation2 + $0xc0] sm:$0xff] %v2955_v7  ;;  %v2862_v22 = vadd.f32 %v2757_v16, %v2718_v14  ;;  %v2958_v21 = vadd.f32 %v2934_v60, %v2757_v16  ;;  %v2580_v60 = vld [vmem:[#allocation2 + $0x48] sm:$0xff] }
 0x34c   :  { %v2752_v57 = vpop.permute.xlu0 %2751  ;;  %v2497_v24 = vmul.f32 %v3692_v11, %v2473_v3  ;;  %v2916_v9 = vld [vmem:[#allocation2 + $0x108] sm:$0xff] }
 0x34d   :  { %2886 = vst [vmem:[#allocation2 + $0x18] sm:$0xff] %v2862_v22  ;;  %2982 = vst [vmem:[#allocation2 + $0xd8] sm:$0xff] %v2958_v21  ;;  %v2861_v26 = vadd.f32 %v2752_v57, %v2717_v20  ;;  %v2957_v18 = vadd.f32 %v2933_v19, %v2752_v57  ;;  %v2581_v22 = vld [vmem:[#allocation2 + $0x50] sm:$0xff] }
 0x34e   :  { %2707 = vperm.xlu0 %3353, %v2497_v24   ;;  %v2623_v29 = vpop.permute.xlu1 %2622  ;;  %v2545_v33 = vmul.f32 %v2497_v24, %v4735_v25  ;;  %v2917_v21 = vld [vmem:[#allocation2 + $0x110] sm:$0xff] }
 0x34f   :  { %2885 = vst [vmem:[#allocation2 + $0x10] sm:$0xff] %v2861_v26  ;;  %2981 = vst [vmem:[#allocation2 + $0xd0] sm:$0xff] %v2957_v18  ;;  %v2720_v46 = vmul.f32 %v2623_v29, %v2576_v39  ;;  %v2936_v49 = vmul.f32 %v2912_v34, %v2623_v29 }
 0x350   :  { %v2618_v12 = vpop.permute.xlu0 %2617  ;;  %v2569_v28 = vsub.f32 %v2521_v30, %v2545_v33  ;;  %v2582_v33 = vld [vmem:[#allocation2 + $0x58] sm:$0xff] }
 0x351   :  { %v3694_v45 = vpop.eup %3693  ;;  %v2719_v51 = vmul.f32 %v2618_v12, %v2575_v17  ;;  %v2935_v25 = vmul.f32 %v2911_v44, %v2618_v12  ;;  %v2919_v17 = vld [vmem:[#allocation2 + $0x120] sm:$0xff] }
 0x352   :  { %2851 = vperm.xlu0 %3353, %v2569_v28   ;;  %v2767_v50 = vpop.permute.xlu1 %2766  ;;  %v2498_v42 = vmul.f32 %v3694_v45, %v2474_v38  ;;  %v2918_v38 = vld [vmem:[#allocation2 + $0x118] sm:$0xff] }
 0x353   :  { %v2864_v54 = vadd.f32 %v2767_v50, %v2720_v46  ;;  %v2960_v56 = vadd.f32 %v2936_v49, %v2767_v50  ;;  %v2583_v49 = vld [vmem:[#allocation2 + $0x60] sm:$0xff] }
 0x354   :  { %v2762_v59 = vpop.permute.xlu0 %2761  ;;  %2712 = vperm.xlu1 %3354, %v2498_v42   ;;  %v2546_v35 = vmul.f32 %v2498_v42, %v4742_v13 }
 0x355   :  { %2888 = vst [vmem:[#allocation2 + $0x28] sm:$0xff] %v2864_v54  ;;  %2984 = vst [vmem:[#allocation2 + $0xe8] sm:$0xff] %v2960_v56  ;;  %v2863_v40 = vadd.f32 %v2762_v59, %v2719_v51  ;;  %v2959_v27 = vadd.f32 %v2935_v25, %v2762_v59  ;;  %v2584_v56 = vld [vmem:[#allocation2 + $0x68] sm:$0xff] }
 0x356   :  { %v2633_v8 = vpop.permute.xlu1 %2632  ;;  %v2570_v63 = vsub.f32 %v2522_v61, %v2546_v35  ;;  %v2920_v61 = vld [vmem:[#allocation2 + $0x128] sm:$0xff] }
 0x357   :  { %2887 = vst [vmem:[#allocation2 + $0x20] sm:$0xff] %v2863_v40  ;;  %2983 = vst [vmem:[#allocation2 + $0xe0] sm:$0xff] %v2959_v27  ;;  %v2722_v41 = vmul.f32 %v2633_v8, %v2578_v23  ;;  %v2938_v47 = vmul.f32 %v2914_v31, %v2633_v8  ;;  %v2585_v23 = vld [vmem:[#allocation2 + $0x70] sm:$0xff] }
 0x358   :  { %v2628_v37 = vpop.permute.xlu0 %2627  ;;  %2856 = vperm.xlu1 %3354, %v2570_v63   ;;  %v2921_v31 = vld [vmem:[#allocation2 + $0x130] sm:$0xff] }
 0x359   :  { %v2721_v62 = vmul.f32 %v2628_v37, %v2577_v48  ;;  %v2937_v36 = vmul.f32 %v2913_v52, %v2628_v37 }
 0x35a   :  { %v2777_v55 = vpop.permute.xlu1 %2776 }
 0x35b   :  { %v2866_v13 = vadd.f32 %v2777_v55, %v2722_v41  ;;  %v2962_v0 = vadd.f32 %v2938_v47, %v2777_v55 }
 0x35c   :  { %v2772_v1 = vpop.permute.xlu0 %2771 }
 0x35d   :  { %2890 = vst [vmem:[#allocation2 + $0x38] sm:$0xff] %v2866_v13  ;;  %2986 = vst [vmem:[#allocation2 + $0xf8] sm:$0xff] %v2962_v0  ;;  %v2865_v4 = vadd.f32 %v2772_v1, %v2721_v62  ;;  %v2961_v5 = vadd.f32 %v2937_v36, %v2772_v1  ;;  %v2586_v62 = vld [vmem:[#allocation2 + $0x78] sm:$0xff] }
 0x35e   :  { %v2922_v36 = vld [vmem:[#allocation2 + $0x138] sm:$0xff] }
 0x35f   :  { %2889 = vst [vmem:[#allocation2 + $0x30] sm:$0xff] %v2865_v4  ;;  %2985 = vst [vmem:[#allocation2 + $0xf0] sm:$0xff] %v2961_v5 }
 0x360   :  { %v2638_v53 = vpop.permute.xlu0 %2637 }
 0x361   :  { %v2723_v6 = vmul.f32 %v2638_v53, %v2579_v58  ;;  %v2939_v10 = vmul.f32 %v2915_v2, %v2638_v53  ;;  %v2587_v58 = vld [vmem:[#allocation2 + $0x80] sm:$0xff] }
 0x362   :  { %v2923_v2 = vld [vmem:[#allocation2 + $0x140] sm:$0xff] }
 0x363   :  { %v2643_v32 = vpop.permute.xlu1 %2642 }
 0x364   :  { %v2782_v14 = vpop.permute.xlu0 %2781  ;;  %v2724_v43 = vmul.f32 %v2643_v32, %v2580_v60  ;;  %v2940_v15 = vmul.f32 %v2916_v9, %v2643_v32 }
 0x365   :  { %v2867_v7 = vadd.f32 %v2782_v14, %v2723_v6  ;;  %v2963_v3 = vadd.f32 %v2939_v10, %v2782_v14 }
 0x367   :  { %2891 = vst [vmem:[#allocation2 + $0x40] sm:$0xff] %v2867_v7  ;;  %2987 = vst [vmem:[#allocation2 + $0x100] sm:$0xff] %v2963_v3  ;;  %v2787_v16 = vpop.permute.xlu1 %2786  ;;  %v2588_v7 = vld [vmem:[#allocation2 + $0x88] sm:$0xff] }
 0x368   :  { %v2868_v11 = vadd.f32 %v2787_v16, %v2724_v43  ;;  %v2964_v20 = vadd.f32 %v2940_v15, %v2787_v16  ;;  %v2924_v3 = vld [vmem:[#allocation2 + $0x148] sm:$0xff] }
 0x36a   :  { %2892 = vst [vmem:[#allocation2 + $0x48] sm:$0xff] %v2868_v11  ;;  %2988 = vst [vmem:[#allocation2 + $0x108] sm:$0xff] %v2964_v20 }
 0x36d   :  { %v2648_v19 = vpop.permute.xlu0 %2647 }
 0x36e   :  { %v2725_v57 = vmul.f32 %v2648_v19, %v2581_v22  ;;  %v2941_v24 = vmul.f32 %v2917_v21, %v2648_v19  ;;  %v2589_v22 = vld [vmem:[#allocation2 + $0x90] sm:$0xff] }
 0x36f   :  { %v2925_v21 = vld [vmem:[#allocation2 + $0x150] sm:$0xff] }
 0x371   :  { %v2792_v26 = vpop.permute.xlu0 %2791 }
 0x372   :  { %v2869_v18 = vadd.f32 %v2792_v26, %v2725_v57  ;;  %v2965_v30 = vadd.f32 %v2941_v24, %v2792_v26 }
 0x373   :  { %v2653_v29 = vpop.permute.xlu1 %2652 }
 0x374   :  { %2893 = vst [vmem:[#allocation2 + $0x50] sm:$0xff] %v2869_v18  ;;  %2989 = vst [vmem:[#allocation2 + $0x110] sm:$0xff] %v2965_v30  ;;  %v2726_v39 = vmul.f32 %v2653_v29, %v2582_v33  ;;  %v2942_v34 = vmul.f32 %v2918_v38, %v2653_v29  ;;  %v2590_v33 = vld [vmem:[#allocation2 + $0x98] sm:$0xff] }
 0x375   :  { %v2926_v38 = vld [vmem:[#allocation2 + $0x158] sm:$0xff] }
 0x377   :  { %v2797_v12 = vpop.permute.xlu1 %2796 }
 0x378   :  { %v2870_v28 = vadd.f32 %v2797_v12, %v2726_v39  ;;  %v2966_v45 = vadd.f32 %v2942_v34, %v2797_v12 }
 0x37a   :  { %2894 = vst [vmem:[#allocation2 + $0x58] sm:$0xff] %v2870_v28  ;;  %2990 = vst [vmem:[#allocation2 + $0x118] sm:$0xff] %v2966_v45 }
 0x37d   :  { %v2658_v46 = vpop.permute.xlu0 %2657 }
 0x37e   :  { %v2727_v44 = vmul.f32 %v2658_v46, %v2583_v49  ;;  %v2943_v50 = vmul.f32 %v2919_v17, %v2658_v46  ;;  %v2591_v49 = vld [vmem:[#allocation2 + $0xa0] sm:$0xff] }
 0x37f   :  { %v2927_v17 = vld [vmem:[#allocation2 + $0x160] sm:$0xff] }
 0x381   :  { %v2802_v42 = vpop.permute.xlu0 %2801 }
 0x382   :  { %v2871_v51 = vadd.f32 %v2802_v42, %v2727_v44  ;;  %v2967_v25 = vadd.f32 %v2943_v50, %v2802_v42 }
 0x383   :  { %v2663_v54 = vpop.permute.xlu1 %2662 }
 0x384   :  { %2895 = vst [vmem:[#allocation2 + $0x60] sm:$0xff] %v2871_v51  ;;  %2991 = vst [vmem:[#allocation2 + $0x120] sm:$0xff] %v2967_v25  ;;  %v2728_v59 = vmul.f32 %v2663_v54, %v2584_v56  ;;  %v2944_v35 = vmul.f32 %v2920_v61, %v2663_v54  ;;  %v2592_v56 = vld [vmem:[#allocation2 + $0xa8] sm:$0xff] }
 0x385   :  { %v2928_v61 = vld [vmem:[#allocation2 + $0x168] sm:$0xff] }
 0x387   :  { %v2807_v40 = vpop.permute.xlu1 %2806 }
 0x388   :  { %v2872_v27 = vadd.f32 %v2807_v40, %v2728_v59  ;;  %v2968_v8 = vadd.f32 %v2944_v35, %v2807_v40 }
 0x38a   :  { %2896 = vst [vmem:[#allocation2 + $0x68] sm:$0xff] %v2872_v27  ;;  %2992 = vst [vmem:[#allocation2 + $0x128] sm:$0xff] %v2968_v8 }
 0x38d   :  { %v2668_v63 = vpop.permute.xlu0 %2667 }
 0x38e   :  { %v2729_v37 = vmul.f32 %v2668_v63, %v2585_v23  ;;  %v2945_v41 = vmul.f32 %v2921_v31, %v2668_v63  ;;  %v2593_v23 = vld [vmem:[#allocation2 + $0xb0] sm:$0xff] }
 0x38f   :  { %v2929_v31 = vld [vmem:[#allocation2 + $0x170] sm:$0xff] }
 0x391   :  { %v2812_v47 = vpop.permute.xlu0 %2811 }
 0x392   :  { %v2873_v48 = vadd.f32 %v2812_v47, %v2729_v37  ;;  %v2969_v52 = vadd.f32 %v2945_v41, %v2812_v47 }
 0x393   :  { %v2673_v55 = vpop.permute.xlu1 %2672 }
 0x394   :  { %2897 = vst [vmem:[#allocation2 + $0x70] sm:$0xff] %v2873_v48  ;;  %2993 = vst [vmem:[#allocation2 + $0x130] sm:$0xff] %v2969_v52  ;;  %v2730_v13 = vmul.f32 %v2673_v55, %v2586_v62  ;;  %v2946_v0 = vmul.f32 %v2922_v36, %v2673_v55  ;;  %v2594_v62 = vld [vmem:[#allocation2 + $0xb8] sm:$0xff] }
 0x395   :  { %v2930_v36 = vld [vmem:[#allocation2 + $0x178] sm:$0xff] }
 0x397   :  { %v2817_v1 = vpop.permute.xlu1 %2816 }
 0x398   :  { %v2874_v4 = vadd.f32 %v2817_v1, %v2730_v13  ;;  %v2970_v5 = vadd.f32 %v2946_v0, %v2817_v1 }
 0x39a   :  { %2898 = vst [vmem:[#allocation2 + $0x78] sm:$0xff] %v2874_v4  ;;  %2994 = vst [vmem:[#allocation2 + $0x138] sm:$0xff] %v2970_v5 }
 0x39d   :  { %v2678_v53 = vpop.permute.xlu0 %2677 }
 0x39e   :  { %v2731_v6 = vmul.f32 %v2678_v53, %v2587_v58  ;;  %v2947_v10 = vmul.f32 %v2923_v2, %v2678_v53 }
 0x3a1   :  { %v2822_v32 = vpop.permute.xlu0 %2821 }
 0x3a2   :  { %v2875_v14 = vadd.f32 %v2822_v32, %v2731_v6  ;;  %v2971_v60 = vadd.f32 %v2947_v10, %v2822_v32 }
 0x3a3   :  { %v2683_v9 = vpop.permute.xlu1 %2682 }
 0x3a4   :  { %2899 = vst [vmem:[#allocation2 + $0x80] sm:$0xff] %v2875_v14  ;;  %2995 = vst [vmem:[#allocation2 + $0x140] sm:$0xff] %v2971_v60  ;;  %v2732_v43 = vmul.f32 %v2683_v9, %v2588_v7  ;;  %v2948_v15 = vmul.f32 %v2924_v3, %v2683_v9 }
 0x3a7   :  { %v2827_v16 = vpop.permute.xlu1 %2826 }
 0x3a8   :  { %v2876_v11 = vadd.f32 %v2827_v16, %v2732_v43  ;;  %v2972_v20 = vadd.f32 %v2948_v15, %v2827_v16 }
 0x3aa   :  { %2900 = vst [vmem:[#allocation2 + $0x88] sm:$0xff] %v2876_v11  ;;  %2996 = vst [vmem:[#allocation2 + $0x148] sm:$0xff] %v2972_v20 }
 0x3ad   :  { %v2688_v19 = vpop.permute.xlu0 %2687 }
 0x3ae   :  { %v2733_v57 = vmul.f32 %v2688_v19, %v2589_v22  ;;  %v2949_v24 = vmul.f32 %v2925_v21, %v2688_v19 }
 0x3b1   :  { %v2832_v26 = vpop.permute.xlu0 %2831 }
 0x3b2   :  { %v2877_v18 = vadd.f32 %v2832_v26, %v2733_v57  ;;  %v2973_v30 = vadd.f32 %v2949_v24, %v2832_v26 }
 0x3b3   :  { %v2693_v29 = vpop.permute.xlu1 %2692 }
 0x3b4   :  { %2901 = vst [vmem:[#allocation2 + $0x90] sm:$0xff] %v2877_v18  ;;  %2997 = vst [vmem:[#allocation2 + $0x150] sm:$0xff] %v2973_v30  ;;  %v2734_v39 = vmul.f32 %v2693_v29, %v2590_v33  ;;  %v2950_v34 = vmul.f32 %v2926_v38, %v2693_v29 }
 0x3b7   :  { %v2837_v12 = vpop.permute.xlu1 %2836 }
 0x3b8   :  { %v2878_v28 = vadd.f32 %v2837_v12, %v2734_v39  ;;  %v2974_v45 = vadd.f32 %v2950_v34, %v2837_v12 }
 0x3ba   :  { %2902 = vst [vmem:[#allocation2 + $0x98] sm:$0xff] %v2878_v28  ;;  %2998 = vst [vmem:[#allocation2 + $0x158] sm:$0xff] %v2974_v45 }
 0x3bd   :  { %v2698_v46 = vpop.permute.xlu0 %2697 }
 0x3be   :  { %v2735_v44 = vmul.f32 %v2698_v46, %v2591_v49  ;;  %v2951_v50 = vmul.f32 %v2927_v17, %v2698_v46 }
 0x3c1   :  { %v2842_v42 = vpop.permute.xlu0 %2841 }
 0x3c2   :  { %v2879_v51 = vadd.f32 %v2842_v42, %v2735_v44  ;;  %v2975_v25 = vadd.f32 %v2951_v50, %v2842_v42 }
 0x3c3   :  { %v2703_v54 = vpop.permute.xlu1 %2702 }
 0x3c4   :  { %2903 = vst [vmem:[#allocation2 + $0xa0] sm:$0xff] %v2879_v51  ;;  %2999 = vst [vmem:[#allocation2 + $0x160] sm:$0xff] %v2975_v25  ;;  %v2736_v59 = vmul.f32 %v2703_v54, %v2592_v56  ;;  %v2952_v35 = vmul.f32 %v2928_v61, %v2703_v54 }
 0x3c7   :  { %v2847_v40 = vpop.permute.xlu1 %2846 }
 0x3c8   :  { %v2880_v27 = vadd.f32 %v2847_v40, %v2736_v59  ;;  %v2976_v8 = vadd.f32 %v2952_v35, %v2847_v40 }
 0x3ca   :  { %2904 = vst [vmem:[#allocation2 + $0xa8] sm:$0xff] %v2880_v27  ;;  %3000 = vst [vmem:[#allocation2 + $0x168] sm:$0xff] %v2976_v8 }
 0x3cd   :  { %v2708_v63 = vpop.permute.xlu0 %2707 }
 0x3ce   :  { %v2737_v37 = vmul.f32 %v2708_v63, %v2593_v23  ;;  %v2953_v41 = vmul.f32 %v2929_v31, %v2708_v63 }
 0x3d1   :  { %v2852_v47 = vpop.permute.xlu0 %2851 }
 0x3d2   :  { %v2881_v48 = vadd.f32 %v2852_v47, %v2737_v37  ;;  %v2977_v52 = vadd.f32 %v2953_v41, %v2852_v47 }
 0x3d3   :  { %v2713_v55 = vpop.permute.xlu1 %2712 }
 0x3d4   :  { %2905 = vst [vmem:[#allocation2 + $0xb0] sm:$0xff] %v2881_v48  ;;  %3001 = vst [vmem:[#allocation2 + $0x170] sm:$0xff] %v2977_v52  ;;  %v2738_v13 = vmul.f32 %v2713_v55, %v2594_v62  ;;  %v2954_v0 = vmul.f32 %v2930_v36, %v2713_v55 }
 0x3d7   :  { %v2857_v1 = vpop.permute.xlu1 %2856 }
 0x3d8   :  { %v2882_v4 = vadd.f32 %v2857_v1, %v2738_v13  ;;  %v2978_v5 = vadd.f32 %v2954_v0, %v2857_v1 }
 0x3da   :  { %2906 = vst [vmem:[#allocation2 + $0xb8] sm:$0xff] %v2882_v4  ;;  %3002 = vst [vmem:[#allocation2 + $0x178] sm:$0xff] %v2978_v5 }
 0x3db   :  { %3706 = shalt.err (!%p3703_p4)
}
 0x3dc   :  { %s3707_s25 = scalar_lea.hbm %s4788_s5, 6144 }
 0x3dd   :  { %p3708_p5 = scmp.ne.s32.totalorder %s4788_s5, %s3707_s25  ;;  %p3711_p6 = scmp.lt.u32.totalorder %s3707_s25, %s4788_s5 }
 0x3df   :  { %p3713_p7 = pnand %p3711_p6, %p3708_p5 }
 0x3e1   :  { %3716 = shalt.err (!%p3713_p7)
}
 0x3e2   :  { %s3723_s30 = smov 128   ;;  %s3724_s6 = smov 8  }
 0x3e3   :  { %3014 = dma.vmem_to_hbm [thread:$0]  %s3009_s4, 6144, %s4788_s5, [#allocation3], %s3723_s30, %s3723_s30, %s3724_s6  }
 0x3e4   :  { %3717 = dma.done.wait [#allocation3], 6144  }
 0x3e5   :  { %3718 = vsyncadd [#allocation3], 4294961152 }
 0x3e6   :  { %3018 = vsyncpa [#allocation3], 1 }

</bundles_post_ra>
